<compile_context>
chip_gen: v5e
topology: v5e:2x2
jax: 0.10.0
libtpu: 0.0.40
codegen_flags: <defaults>
</compile_context>

<pallas_src>
import functools

import jax
import jax.numpy as jnp
from jax import lax
from jax.experimental import pallas as pl
from jax.experimental.pallas import tpu as pltpu


def _round_up(v, m):
    return (v + m - 1) // m * m


def _gru_vae_encoder_kernel(
    x_f_ref,      # (Tc*Bp, D)   forward-direction time chunk (time-major rows)
    x_b_ref,      # (Tc*Bp, D)   backward-direction time chunk (chunk nc-1-i)
    w_ih_f_ref,   # (D, 3Hc)     input weights, fwd dir, cols [r|z|n] each Hc wide
    w_ih_b_ref,   # (D, 3Hc)
    b_i_f_ref,    # (1, 3Hc)     r/z: b_ih+b_hh folded; n: b_ih only
    b_i_b_ref,    # (1, 3Hc)
    w_rec_ref,    # (2Hc, 6Hc)   rows [h_f|h_b]; cols [rf|zf|nf|rb|zb|nb]
    b_hn_f_ref,   # (1, Hc)      hidden bias of n-gate, forward
    b_hn_b_ref,   # (1, Hc)      hidden bias of n-gate, backward
    w_head_ref,   # (2Hc, Np)    fused [mu | logvar | 0-pad] head on [h_f|h_b]
    b_head_ref,   # (1, Np)
    out_ref,      # (Bp, Np)     lane-padded fused output slab
    gi_f_ref,     # scratch (Tc*Bp, 3Hc) f32
    gi_b_ref,     # scratch (Tc*Bp, 3Hc) f32
    h_ref,        # scratch (Bp, 2Hc) f32, hidden state carried across chunks
    *,
    tc, bp, hc, unroll, mm_dtype,
):
    i = pl.program_id(0)
    nc = pl.num_programs(0)

    # ---- Per-chunk input projection: one MXU pass per direction covering all
    # three gates of every time step in the chunk (biases folded in).
    gi_f_ref[...] = (
        jnp.dot(x_f_ref[...].astype(mm_dtype), w_ih_f_ref[...],
                preferred_element_type=jnp.float32)
        + b_i_f_ref[...]
    )
    gi_b_ref[...] = (
        jnp.dot(x_b_ref[...].astype(mm_dtype), w_ih_b_ref[...],
                preferred_element_type=jnp.float32)
        + b_i_b_ref[...]
    )

    @pl.when(i == 0)
    def _():
        h_ref[...] = jnp.zeros_like(h_ref)

    def one_step(t, h):
        # forward uses local time t; backward uses local time tc-1-t of its chunk
        rf = pl.multiple_of(t * bp, bp)
        rb = pl.multiple_of((tc - 1 - t) * bp, bp)
        gi_tf = gi_f_ref[pl.ds(rf, bp), :]          # (Bp, 3Hc)
        gi_tb = gi_b_ref[pl.ds(rb, bp), :]          # (Bp, 3Hc)

        # ONE recurrent dot per step for both directions and all gates.
        # TODO(synk): for very small Bp consider pltpu.matmul_push_rhs to keep
        # W_rec resident in the MXU weight registers across the whole loop.
        gh = jnp.dot(h.astype(mm_dtype), w_rec_ref[...],
                     preferred_element_type=jnp.float32)   # (Bp, 6Hc)

        # packed [r|z] sigmoid per direction (2 EUP pushes instead of 4)
        a_f = jax.nn.sigmoid(gi_tf[:, : 2 * hc] + gh[:, 0 * hc: 2 * hc])
        a_b = jax.nn.sigmoid(gi_tb[:, : 2 * hc] + gh[:, 3 * hc: 5 * hc])
        r_f, z_f = a_f[:, :hc], a_f[:, hc:]
        r_b, z_b = a_b[:, :hc], a_b[:, hc:]

        n_f = jnp.tanh(gi_tf[:, 2 * hc:]
                       + r_f * (gh[:, 2 * hc: 3 * hc] + b_hn_f_ref[...]))
        n_b = jnp.tanh(gi_tb[:, 2 * hc:]
                       + r_b * (gh[:, 5 * hc: 6 * hc] + b_hn_b_ref[...]))

        h_f = (1.0 - z_f) * n_f + z_f * h[:, :hc]
        h_b = (1.0 - z_b) * n_b + z_b * h[:, hc:]
        # hc is a multiple of 128 -> lane concat is pure vreg placement
        return jnp.concatenate([h_f, h_b], axis=1)

    def unrolled_body(s, h):
        t0 = s * unroll
        for u in range(unroll):     # manual unroll: keeps fwd/bwd chains in flight
            h = one_step(t0 + u, h)
        return h

    h_fin = lax.fori_loop(0, tc // unroll, unrolled_body, h_ref[...])
    h_ref[...] = h_fin

    @pl.when(i == nc - 1)
    def _():
        # fused mu/logvar head: single MXU pass, lane-dense padded store
        out_ref[...] = (
            jnp.dot(h_fin.astype(mm_dtype), w_head_ref[...],
                    preferred_element_type=jnp.float32)
            + b_head_ref[...]
        )


def _prepare_kernel_params(p, H, Hc, L, Np, mm_dtype):
    """PyTorch-layout params -> lane-aligned, MXU-friendly kernel layout."""
    f32 = jnp.float32

    def pad_gate_cols(w):  # (rows, 3H) -> (rows, 3Hc), gate g placed at g*Hc
        rows = w.shape[0]
        out = jnp.zeros((rows, 3 * Hc), f32)
        for g in range(3):
            out = out.at[:, g * Hc:g * Hc + H].set(w[:, g * H:(g + 1) * H])
        return out

    # input-projection weights (D, 3Hc) per direction, gate order [r z n]
    w_ih_f = pad_gate_cols(p["w_ih_f"].T)
    w_ih_b = pad_gate_cols(p["w_ih_b"].T)

    def comb_bias(b_ih, b_hh):  # fold b_hh into r/z; keep n-gate input bias alone
        b = jnp.concatenate([b_ih[:2 * H] + b_hh[:2 * H], b_ih[2 * H:]])
        return pad_gate_cols(b.reshape(1, 3 * H))

    b_i_f = comb_bias(p["b_ih_f"], p["b_hh_f"])
    b_i_b = comb_bias(p["b_ih_b"], p["b_hh_b"])

    # block recurrent weight: rows [h_f | h_b], cols [rf zf nf rb zb nb]
    w_rec = jnp.zeros((2 * Hc, 6 * Hc), f32)
    for g in range(3):
        wf_g = p["w_hh_f"][g * H:(g + 1) * H, :].T    # (H, H): h_f @ wf_g
        wb_g = p["w_hh_b"][g * H:(g + 1) * H, :].T
        w_rec = w_rec.at[0:H, g * Hc:g * Hc + H].set(wf_g)
        w_rec = w_rec.at[Hc:Hc + H, (3 + g) * Hc:(3 + g) * Hc + H].set(wb_g)

    b_hn_f = jnp.zeros((1, Hc), f32).at[0, :H].set(p["b_hh_f"][2 * H:])
    b_hn_b = jnp.zeros((1, Hc), f32).at[0, :H].set(p["b_hh_b"][2 * H:])

    # fused head on [h_f | h_b]: cols [mu | logvar | 0-pad]
    w_head = jnp.zeros((2 * Hc, Np), f32)
    w_head = w_head.at[0:H, :L].set(p["w_mu"][:, :H].T)
    w_head = w_head.at[Hc:Hc + H, :L].set(p["w_mu"][:, H:].T)
    w_head = w_head.at[0:H, L:2 * L].set(p["w_lv"][:, :H].T)
    w_head = w_head.at[Hc:Hc + H, L:2 * L].set(p["w_lv"][:, H:].T)
    b_head = (jnp.zeros((1, Np), f32)
              .at[0, :L].set(p["b_mu"]).at[0, L:2 * L].set(p["b_lv"]))

    # only matmul *operands* are cast; biases / gate math stay f32
    cast = lambda a: a.astype(mm_dtype)
    return (cast(w_ih_f), cast(w_ih_b), b_i_f, b_i_b, cast(w_rec),
            b_hn_f, b_hn_b, cast(w_head), b_head)


def _choose_time_chunk(T, target=64):
    tc = 1
    for c in range(1, min(T, target) + 1):
        if T % c == 0:
            tc = c
    return tc


def gru_vae_encoder(x, params, *, matmul_dtype=jnp.float32, time_chunk=None):
    """x: (T, B, D) float32; params: PyTorch-layout dict. Returns (mu, logvar).

    matmul_dtype: set to jnp.bfloat16 on v6e/v7x for ~4x MXU throughput; hidden
    state, gate math and accumulation stay f32 (v5e has no bf16 VPU, so its
    elementwise path is untouched either way).
    """
    T, B, D = x.shape
    H = params["w_hh_f"].shape[1]
    L = params["b_mu"].shape[0]

    Hc = _round_up(H, 128)              # lane-aligned gate chunk width
    Bp = max(8, _round_up(B, 8))        # pad batch to a full sublane tile
    Np = 128                            # lane-padded fused [mu|logvar] width
    assert 2 * L <= Np, "latent_dim too large for the fused 128-lane head"

    if time_chunk is None:
        tc = _choose_time_chunk(T)
    else:
        assert T % time_chunk == 0
        tc = time_chunk
    nc = T // tc
    unroll = 2 if tc % 2 == 0 else 1

    x_p = jnp.zeros((T, Bp, D), jnp.float32).at[:, :B, :].set(x)
    x2d = x_p.reshape(T * Bp, D)        # time-major rows

    kparams = _prepare_kernel_params(params, H, Hc, L, Np, matmul_dtype)

    def full_spec(a):
        zeros = (0,) * a.ndim
        return pl.BlockSpec(a.shape, lambda i: zeros)

    grid_spec = pltpu.PrefetchScalarGridSpec(
        num_scalar_prefetch=0,
        grid=(nc,),
        in_specs=[
            pl.BlockSpec((tc * Bp, D), lambda i: (i, 0)),             # fwd chunk
            pl.BlockSpec((tc * Bp, D), lambda i: (nc - 1 - i, 0)),    # bwd chunk
        ] + [full_spec(a) for a in kparams],
        out_specs=pl.BlockSpec((Bp, Np), lambda i: (0, 0)),
        scratch_shapes=[
            pltpu.VMEM((tc * Bp, 3 * Hc), jnp.float32),   # gi_f
            pltpu.VMEM((tc * Bp, 3 * Hc), jnp.float32),   # gi_b
            pltpu.VMEM((Bp, 2 * Hc), jnp.float32),        # carried hidden state
        ],
    )

    # VMEM budget: actual footprint + headroom, capped at 48 MiB (v7x-safe).
    wbytes = jnp.dtype(matmul_dtype).itemsize
    footprint = (
        2 * 2 * tc * Bp * D * 4                      # x chunks (fwd+bwd), 2x-buffered
        + 2 * tc * Bp * 3 * Hc * 4                   # gi scratch
        + Bp * 2 * Hc * 4 + 2 * Bp * Np * 4          # h scratch + output block
        + (2 * D * 3 * Hc + 2 * Hc * 6 * Hc + 2 * Hc * Np) * wbytes  # weights
        + (2 * 3 * Hc + 2 * Hc + Np) * 4             # biases
    )
    vmem_limit = int(min(48 * 1024 * 1024, max(16 * 1024 * 1024, 2 * footprint)))

    kernel = functools.partial(
        _gru_vae_encoder_kernel,
        tc=tc, bp=Bp, hc=Hc, unroll=unroll, mm_dtype=matmul_dtype,
    )

    # TODO(synk): on v7x with large B, add a leading "parallel" grid axis over
    # batch blocks (or pl.core_map) so both TensorCores are used.
    out = pl.pallas_call(
        kernel,
        out_shape=jax.ShapeDtypeStruct((Bp, Np), jnp.float32),
        grid_spec=grid_spec,
        compiler_params=pltpu.CompilerParams(
            dimension_semantics=("arbitrary",),
            vmem_limit_bytes=vmem_limit,
        ),
    )(x2d, x2d, *kparams)

    mu = out[:B, :L]
    logvar = out[:B, L:2 * L]
    return mu, logvar


def init_params(key, input_dim, hidden_dim, latent_dim):
    """Deterministic synthetic parameters in PyTorch nn.GRU / nn.Linear layout."""
    H, D, L = hidden_dim, input_dim, latent_dim
    k = 1.0 / jnp.sqrt(jnp.float32(H))
    keys = jax.random.split(key, 12)

    def u(kk, shape):
        return jax.random.uniform(kk, shape, jnp.float32, -k, k)

    return {
        # forward direction GRU (gate order r, z, n)
        "w_ih_f": u(keys[0], (3 * H, D)),
        "w_hh_f": u(keys[1], (3 * H, H)),
        "b_ih_f": u(keys[2], (3 * H,)),
        "b_hh_f": u(keys[3], (3 * H,)),
        # backward direction GRU
        "w_ih_b": u(keys[4], (3 * H, D)),
        "w_hh_b": u(keys[5], (3 * H, H)),
        "b_ih_b": u(keys[6], (3 * H,)),
        "b_hh_b": u(keys[7], (3 * H,)),
        # fc_mu / fc_logvar: Linear(2H, L)
        "w_mu": u(keys[8], (L, 2 * H)),
        "b_mu": u(keys[9], (L,)),
        "w_lv": u(keys[10], (L, 2 * H)),
        "b_lv": u(keys[11], (L,)),
    }


def reference_forward(x, p):
    """Pure-JAX reference mirroring torch.nn.GRU(bidirectional=True) + Linear heads."""
    T, B, D = x.shape
    H = p["w_hh_f"].shape[1]

    def run(w_ih, w_hh, b_ih, b_hh, xs):
        def step(h, x_t):
            gi = x_t @ w_ih.T + b_ih
            gh = h @ w_hh.T + b_hh
            r = jax.nn.sigmoid(gi[:, :H] + gh[:, :H])
            z = jax.nn.sigmoid(gi[:, H:2 * H] + gh[:, H:2 * H])
            n = jnp.tanh(gi[:, 2 * H:] + r * gh[:, 2 * H:])
            return (1.0 - z) * n + z * h, None

        h0 = jnp.zeros((B, H), jnp.float32)
        h_fin, _ = lax.scan(step, h0, xs)
        return h_fin

    h_f = run(p["w_ih_f"], p["w_hh_f"], p["b_ih_f"], p["b_hh_f"], x)
    h_b = run(p["w_ih_b"], p["w_hh_b"], p["b_ih_b"], p["b_hh_b"], x[::-1])
    h_cat = jnp.concatenate([h_f, h_b], axis=1)
    mu = h_cat @ p["w_mu"].T + p["b_mu"]
    lv = h_cat @ p["w_lv"].T + p["b_lv"]
    return mu, lv


if __name__ == "__main__":
    seq_len, batch, input_dim, hidden_dim, latent_dim = 8, 4, 16, 32, 8

    key = jax.random.PRNGKey(0)
    k_x, k_p = jax.random.split(key)
    x = jax.random.normal(k_x, (seq_len, batch, input_dim), jnp.float32)
    params = init_params(k_p, input_dim, hidden_dim, latent_dim)

    mu, logvar = gru_vae_encoder(x, params)
    mu = jax.block_until_ready(mu)
    logvar = jax.block_until_ready(logvar)

    mu_ref, lv_ref = reference_forward(x, params)
    assert mu.shape == (batch, latent_dim) and logvar.shape == (batch, latent_dim)
    assert jnp.allclose(mu, mu_ref, atol=1e-5, rtol=1e-5)
    assert jnp.allclose(logvar, lv_ref, atol=1e-5, rtol=1e-5)

    print("KERNEL_OK")
</pallas_src>

<mosaic_0001>
module attributes {stable_mosaic.version = 11 : i64} {
  func.func @_gru_vae_encoder_kernel(%arg0: i32, %arg1: memref<64x16xf32, #tpu.memory_space<vmem>>, %arg2: memref<64x16xf32, #tpu.memory_space<vmem>>, %arg3: memref<16x384xf32, #tpu.memory_space<vmem>>, %arg4: memref<16x384xf32, #tpu.memory_space<vmem>>, %arg5: memref<1x384xf32, #tpu.memory_space<vmem>>, %arg6: memref<1x384xf32, #tpu.memory_space<vmem>>, %arg7: memref<256x768xf32, #tpu.memory_space<vmem>>, %arg8: memref<1x128xf32, #tpu.memory_space<vmem>>, %arg9: memref<1x128xf32, #tpu.memory_space<vmem>>, %arg10: memref<256x128xf32, #tpu.memory_space<vmem>>, %arg11: memref<1x128xf32, #tpu.memory_space<vmem>>, %arg12: memref<8x128xf32, #tpu.memory_space<vmem>>, %arg13: memref<64x384xf32, #tpu.memory_space<vmem>>, %arg14: memref<64x384xf32, #tpu.memory_space<vmem>>, %arg15: memref<8x256xf32, #tpu.memory_space<vmem>>) attributes {dimension_semantics = [#tpu.dimension_semantics<arbitrary>], iteration_bounds = array<i64: 1>, scalar_prefetch = 0 : i64, scratch_operands = 3 : i64, tpu.core_type = #tpu.core_type<tc>, window_params = [{transform_indices = @transform_0, window_bounds = array<i64: 64, 16>}, {transform_indices = @transform_1, window_bounds = array<i64: 64, 16>}, {pipeline_mode = #tpu.pipeline_mode<synchronous>, transform_indices = @transform_2, window_bounds = array<i64: 16, 384>}, {pipeline_mode = #tpu.pipeline_mode<synchronous>, transform_indices = @transform_3, window_bounds = array<i64: 16, 384>}, {pipeline_mode = #tpu.pipeline_mode<synchronous>, transform_indices = @transform_4, window_bounds = array<i64: 1, 384>}, {pipeline_mode = #tpu.pipeline_mode<synchronous>, transform_indices = @transform_5, window_bounds = array<i64: 1, 384>}, {pipeline_mode = #tpu.pipeline_mode<synchronous>, transform_indices = @transform_6, window_bounds = array<i64: 256, 768>}, {pipeline_mode = #tpu.pipeline_mode<synchronous>, transform_indices = @transform_7, window_bounds = array<i64: 1, 128>}, {pipeline_mode = #tpu.pipeline_mode<synchronous>, transform_indices = @transform_8, window_bounds = array<i64: 1, 128>}, {pipeline_mode = #tpu.pipeline_mode<synchronous>, transform_indices = @transform_9, window_bounds = array<i64: 256, 128>}, {pipeline_mode = #tpu.pipeline_mode<synchronous>, transform_indices = @transform_10, window_bounds = array<i64: 1, 128>}, {pipeline_mode = #tpu.pipeline_mode<synchronous>, transform_indices = @transform_11, window_bounds = array<i64: 8, 128>}]} {
    %c0 = arith.constant 0 : index
    %c0_0 = arith.constant 0 : index
    %0 = vector.load %arg1[%c0, %c0_0] : memref<64x16xf32, #tpu.memory_space<vmem>>, vector<64x16xf32>
    %c0_1 = arith.constant 0 : index
    %c0_2 = arith.constant 0 : index
    %1 = vector.load %arg3[%c0_1, %c0_2] : memref<16x384xf32, #tpu.memory_space<vmem>>, vector<16x384xf32>
    %cst = arith.constant dense<0.000000e+00> : vector<64x384xf32>
    %2 = tpu.matmul %0, %1, %cst {dimension_numbers = #tpu.dot_dimension_numbers<[1], [0], [0], [1], [0, 0, 1, 1], [], []>} : vector<64x16xf32>, vector<16x384xf32>, vector<64x384xf32> -> vector<64x384xf32>
    %c0_3 = arith.constant 0 : index
    %c0_4 = arith.constant 0 : index
    %3 = vector.load %arg5[%c0_3, %c0_4] : memref<1x384xf32, #tpu.memory_space<vmem>>, vector<1x384xf32>
    %4 = vector.broadcast %3 : vector<1x384xf32> to vector<64x384xf32>
    %5 = arith.addf %2, %4 : vector<64x384xf32>
    %c0_5 = arith.constant 0 : index
    %c0_6 = arith.constant 0 : index
    %6 = vector.load %arg13[%c0_5, %c0_6] : memref<64x384xf32, #tpu.memory_space<vmem>>, vector<64x384xf32>
    tpu.vector_store %arg13[%c0_5, %c0_6], %5 {strides = array<i32>} : memref<64x384xf32, #tpu.memory_space<vmem>>, vector<64x384xf32>,
    %c0_7 = arith.constant 0 : index
    %c0_8 = arith.constant 0 : index
    %7 = vector.load %arg2[%c0_7, %c0_8] : memref<64x16xf32, #tpu.memory_space<vmem>>, vector<64x16xf32>
    %c0_9 = arith.constant 0 : index
    %c0_10 = arith.constant 0 : index
    %8 = vector.load %arg4[%c0_9, %c0_10] : memref<16x384xf32, #tpu.memory_space<vmem>>, vector<16x384xf32>
    %cst_11 = arith.constant dense<0.000000e+00> : vector<64x384xf32>
    %9 = tpu.matmul %7, %8, %cst_11 {dimension_numbers = #tpu.dot_dimension_numbers<[1], [0], [0], [1], [0, 0, 1, 1], [], []>} : vector<64x16xf32>, vector<16x384xf32>, vector<64x384xf32> -> vector<64x384xf32>
    %c0_12 = arith.constant 0 : index
    %c0_13 = arith.constant 0 : index
    %10 = vector.load %arg6[%c0_12, %c0_13] : memref<1x384xf32, #tpu.memory_space<vmem>>, vector<1x384xf32>
    %11 = vector.broadcast %10 : vector<1x384xf32> to vector<64x384xf32>
    %12 = arith.addf %9, %11 : vector<64x384xf32>
    %c0_14 = arith.constant 0 : index
    %c0_15 = arith.constant 0 : index
    %13 = vector.load %arg14[%c0_14, %c0_15] : memref<64x384xf32, #tpu.memory_space<vmem>>, vector<64x384xf32>
    tpu.vector_store %arg14[%c0_14, %c0_15], %12 {strides = array<i32>} : memref<64x384xf32, #tpu.memory_space<vmem>>, vector<64x384xf32>,
    %c0_i32 = arith.constant 0 : i32
    %14 = arith.cmpi eq, %arg0, %c0_i32 : i32
    %15 = arith.extui %14 : i1 to i32
    %c0_i32_16 = arith.constant 0 : i32
    %16 = arith.cmpi ne, %15, %c0_i32_16 : i32
    scf.if %16 {
      %cst_25 = arith.constant 0.000000e+00 : f32
      %24 = vector.broadcast %cst_25 : f32 to vector<8x256xf32>
      %c0_26 = arith.constant 0 : index
      %c0_27 = arith.constant 0 : index
      %25 = vector.load %arg15[%c0_26, %c0_27] : memref<8x256xf32, #tpu.memory_space<vmem>>, vector<8x256xf32>
      tpu.vector_store %arg15[%c0_26, %c0_27], %24 {strides = array<i32>} : memref<8x256xf32, #tpu.memory_space<vmem>>, vector<8x256xf32>,
    } else {
    }
    %c0_17 = arith.constant 0 : index
    %c0_18 = arith.constant 0 : index
    %17 = vector.load %arg15[%c0_17, %c0_18] : memref<8x256xf32, #tpu.memory_space<vmem>>, vector<8x256xf32>
    %c0_i32_19 = arith.constant 0 : i32
    %c4_i32 = arith.constant 4 : i32
    %18 = arith.addi %c0_i32_19, %c4_i32 : i32
    %c1_i32 = arith.constant 1 : i32
    %19 = scf.for %arg16 = %c0_i32_19 to %18 step %c1_i32 iter_args(%arg17 = %17) -> (vector<8x256xf32>)  : i32 {
      %c2_i32 = arith.constant 2 : i32
      %24 = arith.muli %arg16, %c2_i32 : i32
      %c0_i32_25 = arith.constant 0 : i32
      %25 = arith.addi %24, %c0_i32_25 : i32
      %c8_i32 = arith.constant 8 : i32
      %26 = arith.muli %25, %c8_i32 : i32
      %27 = tpu.assume_multiple %26, 8 : i32
      %c7_i32 = arith.constant 7 : i32
      %28 = arith.subi %c7_i32, %25 : i32
      %c8_i32_26 = arith.constant 8 : i32
      %29 = arith.muli %28, %c8_i32_26 : i32
      %30 = tpu.assume_multiple %29, 8 : i32
      %31 = arith.index_cast %27 : i32 to index
      %c0_27 = arith.constant 0 : index
      %32 = vector.load %arg13[%31, %c0_27] : memref<64x384xf32, #tpu.memory_space<vmem>>, vector<8x384xf32>
      %33 = arith.index_cast %30 : i32 to index
      %c0_28 = arith.constant 0 : index
      %34 = vector.load %arg14[%33, %c0_28] : memref<64x384xf32, #tpu.memory_space<vmem>>, vector<8x384xf32>
      %c0_29 = arith.constant 0 : index
      %c0_30 = arith.constant 0 : index
      %35 = vector.load %arg7[%c0_29, %c0_30] : memref<256x768xf32, #tpu.memory_space<vmem>>, vector<256x768xf32>
      %cst_31 = arith.constant dense<0.000000e+00> : vector<8x768xf32>
      %36 = tpu.matmul %arg17, %35, %cst_31 {dimension_numbers = #tpu.dot_dimension_numbers<[1], [0], [0], [1], [0, 0, 1, 1], [], []>} : vector<8x256xf32>, vector<256x768xf32>, vector<8x768xf32> -> vector<8x768xf32>
      %37 = vector.extract_strided_slice %32 {offsets = [0, 0], sizes = [8, 256], strides = [1, 1]} : vector<8x384xf32> to vector<8x256xf32>
      %38 = vector.extract_strided_slice %36 {offsets = [0, 0], sizes = [8, 256], strides = [1, 1]} : vector<8x768xf32> to vector<8x256xf32>
      %39 = arith.addf %37, %38 : vector<8x256xf32>
      %40 = arith.negf %39 : vector<8x256xf32>
      %41 = math.exp %40 : vector<8x256xf32>
      %cst_32 = arith.constant 1.000000e+00 : f32
      %42 = vector.broadcast %cst_32 : f32 to vector<8x256xf32>
      %43 = arith.addf %42, %41 : vector<8x256xf32>
      %44 = arith.divf %42, %43 : vector<8x256xf32>
      %45 = vector.extract_strided_slice %34 {offsets = [0, 0], sizes = [8, 256], strides = [1, 1]} : vector<8x384xf32> to vector<8x256xf32>
      %46 = vector.extract_strided_slice %36 {offsets = [0, 384], sizes = [8, 256], strides = [1, 1]} : vector<8x768xf32> to vector<8x256xf32>
      %47 = arith.addf %45, %46 : vector<8x256xf32>
      %48 = arith.negf %47 : vector<8x256xf32>
      %49 = math.exp %48 : vector<8x256xf32>
      %cst_33 = arith.constant 1.000000e+00 : f32
      %50 = vector.broadcast %cst_33 : f32 to vector<8x256xf32>
      %51 = arith.addf %50, %49 : vector<8x256xf32>
      %52 = arith.divf %50, %51 : vector<8x256xf32>
      %53 = vector.extract_strided_slice %44 {offsets = [0, 0], sizes = [8, 128], strides = [1, 1]} : vector<8x256xf32> to vector<8x128xf32>
      %54 = vector.extract_strided_slice %44 {offsets = [0, 128], sizes = [8, 128], strides = [1, 1]} : vector<8x256xf32> to vector<8x128xf32>
      %55 = vector.extract_strided_slice %52 {offsets = [0, 0], sizes = [8, 128], strides = [1, 1]} : vector<8x256xf32> to vector<8x128xf32>
      %56 = vector.extract_strided_slice %52 {offsets = [0, 128], sizes = [8, 128], strides = [1, 1]} : vector<8x256xf32> to vector<8x128xf32>
      %57 = vector.extract_strided_slice %32 {offsets = [0, 256], sizes = [8, 128], strides = [1, 1]} : vector<8x384xf32> to vector<8x128xf32>
      %58 = vector.extract_strided_slice %36 {offsets = [0, 256], sizes = [8, 128], strides = [1, 1]} : vector<8x768xf32> to vector<8x128xf32>
      %c0_34 = arith.constant 0 : index
      %c0_35 = arith.constant 0 : index
      %59 = vector.load %arg8[%c0_34, %c0_35] : memref<1x128xf32, #tpu.memory_space<vmem>>, vector<1x128xf32>
      %60 = vector.broadcast %59 : vector<1x128xf32> to vector<8x128xf32>
      %61 = arith.addf %58, %60 : vector<8x128xf32>
      %62 = arith.mulf %53, %61 : vector<8x128xf32>
      %63 = arith.addf %57, %62 : vector<8x128xf32>
      %64 = math.tanh %63 : vector<8x128xf32>
      %65 = vector.extract_strided_slice %34 {offsets = [0, 256], sizes = [8, 128], strides = [1, 1]} : vector<8x384xf32> to vector<8x128xf32>
      %66 = vector.extract_strided_slice %36 {offsets = [0, 640], sizes = [8, 128], strides = [1, 1]} : vector<8x768xf32> to vector<8x128xf32>
      %c0_36 = arith.constant 0 : index
      %c0_37 = arith.constant 0 : index
      %67 = vector.load %arg9[%c0_36, %c0_37] : memref<1x128xf32, #tpu.memory_space<vmem>>, vector<1x128xf32>
      %68 = vector.broadcast %67 : vector<1x128xf32> to vector<8x128xf32>
      %69 = arith.addf %66, %68 : vector<8x128xf32>
      %70 = arith.mulf %55, %69 : vector<8x128xf32>
      %71 = arith.addf %65, %70 : vector<8x128xf32>
      %72 = math.tanh %71 : vector<8x128xf32>
      %cst_38 = arith.constant 1.000000e+00 : f32
      %73 = vector.broadcast %cst_38 : f32 to vector<8x128xf32>
      %74 = arith.subf %73, %54 : vector<8x128xf32>
      %75 = arith.mulf %74, %64 : vector<8x128xf32>
      %76 = vector.extract_strided_slice %arg17 {offsets = [0, 0], sizes = [8, 128], strides = [1, 1]} : vector<8x256xf32> to vector<8x128xf32>
      %77 = arith.mulf %54, %76 : vector<8x128xf32>
      %78 = arith.addf %75, %77 : vector<8x128xf32>
      %cst_39 = arith.constant 1.000000e+00 : f32
      %79 = vector.broadcast %cst_39 : f32 to vector<8x128xf32>
      %80 = arith.subf %79, %56 : vector<8x128xf32>
      %81 = arith.mulf %80, %72 : vector<8x128xf32>
      %82 = vector.extract_strided_slice %arg17 {offsets = [0, 128], sizes = [8, 128], strides = [1, 1]} : vector<8x256xf32> to vector<8x128xf32>
      %83 = arith.mulf %56, %82 : vector<8x128xf32>
      %84 = arith.addf %81, %83 : vector<8x128xf32>
      %85 = tpu.concatenate %78, %84 in 1 : vector<8x128xf32>, vector<8x128xf32> -> vector<8x256xf32>
      %c1_i32_40 = arith.constant 1 : i32
      %86 = arith.addi %24, %c1_i32_40 : i32
      %c8_i32_41 = arith.constant 8 : i32
      %87 = arith.muli %86, %c8_i32_41 : i32
      %88 = tpu.assume_multiple %87, 8 : i32
      %c7_i32_42 = arith.constant 7 : i32
      %89 = arith.subi %c7_i32_42, %86 : i32
      %c8_i32_43 = arith.constant 8 : i32
      %90 = arith.muli %89, %c8_i32_43 : i32
      %91 = tpu.assume_multiple %90, 8 : i32
      %92 = arith.index_cast %88 : i32 to index
      %c0_44 = arith.constant 0 : index
      %93 = vector.load %arg13[%92, %c0_44] : memref<64x384xf32, #tpu.memory_space<vmem>>, vector<8x384xf32>
      %94 = arith.index_cast %91 : i32 to index
      %c0_45 = arith.constant 0 : index
      %95 = vector.load %arg14[%94, %c0_45] : memref<64x384xf32, #tpu.memory_space<vmem>>, vector<8x384xf32>
      %c0_46 = arith.constant 0 : index
      %c0_47 = arith.constant 0 : index
      %96 = vector.load %arg7[%c0_46, %c0_47] : memref<256x768xf32, #tpu.memory_space<vmem>>, vector<256x768xf32>
      %cst_48 = arith.constant dense<0.000000e+00> : vector<8x768xf32>
      %97 = tpu.matmul %85, %96, %cst_48 {dimension_numbers = #tpu.dot_dimension_numbers<[1], [0], [0], [1], [0, 0, 1, 1], [], []>} : vector<8x256xf32>, vector<256x768xf32>, vector<8x768xf32> -> vector<8x768xf32>
      %98 = vector.extract_strided_slice %93 {offsets = [0, 0], sizes = [8, 256], strides = [1, 1]} : vector<8x384xf32> to vector<8x256xf32>
      %99 = vector.extract_strided_slice %97 {offsets = [0, 0], sizes = [8, 256], strides = [1, 1]} : vector<8x768xf32> to vector<8x256xf32>
      %100 = arith.addf %98, %99 : vector<8x256xf32>
      %101 = arith.negf %100 : vector<8x256xf32>
      %102 = math.exp %101 : vector<8x256xf32>
      %cst_49 = arith.constant 1.000000e+00 : f32
      %103 = vector.broadcast %cst_49 : f32 to vector<8x256xf32>
      %104 = arith.addf %103, %102 : vector<8x256xf32>
      %105 = arith.divf %103, %104 : vector<8x256xf32>
      %106 = vector.extract_strided_slice %95 {offsets = [0, 0], sizes = [8, 256], strides = [1, 1]} : vector<8x384xf32> to vector<8x256xf32>
      %107 = vector.extract_strided_slice %97 {offsets = [0, 384], sizes = [8, 256], strides = [1, 1]} : vector<8x768xf32> to vector<8x256xf32>
      %108 = arith.addf %106, %107 : vector<8x256xf32>
      %109 = arith.negf %108 : vector<8x256xf32>
      %110 = math.exp %109 : vector<8x256xf32>
      %cst_50 = arith.constant 1.000000e+00 : f32
      %111 = vector.broadcast %cst_50 : f32 to vector<8x256xf32>
      %112 = arith.addf %111, %110 : vector<8x256xf32>
      %113 = arith.divf %111, %112 : vector<8x256xf32>
      %114 = vector.extract_strided_slice %105 {offsets = [0, 0], sizes = [8, 128], strides = [1, 1]} : vector<8x256xf32> to vector<8x128xf32>
      %115 = vector.extract_strided_slice %105 {offsets = [0, 128], sizes = [8, 128], strides = [1, 1]} : vector<8x256xf32> to vector<8x128xf32>
      %116 = vector.extract_strided_slice %113 {offsets = [0, 0], sizes = [8, 128], strides = [1, 1]} : vector<8x256xf32> to vector<8x128xf32>
      %117 = vector.extract_strided_slice %113 {offsets = [0, 128], sizes = [8, 128], strides = [1, 1]} : vector<8x256xf32> to vector<8x128xf32>
      %118 = vector.extract_strided_slice %93 {offsets = [0, 256], sizes = [8, 128], strides = [1, 1]} : vector<8x384xf32> to vector<8x128xf32>
      %119 = vector.extract_strided_slice %97 {offsets = [0, 256], sizes = [8, 128], strides = [1, 1]} : vector<8x768xf32> to vector<8x128xf32>
      %c0_51 = arith.constant 0 : index
      %c0_52 = arith.constant 0 : index
      %120 = vector.load %arg8[%c0_51, %c0_52] : memref<1x128xf32, #tpu.memory_space<vmem>>, vector<1x128xf32>
      %121 = vector.broadcast %120 : vector<1x128xf32> to vector<8x128xf32>
      %122 = arith.addf %119, %121 : vector<8x128xf32>
      %123 = arith.mulf %114, %122 : vector<8x128xf32>
      %124 = arith.addf %118, %123 : vector<8x128xf32>
      %125 = math.tanh %124 : vector<8x128xf32>
      %126 = vector.extract_strided_slice %95 {offsets = [0, 256], sizes = [8, 128], strides = [1, 1]} : vector<8x384xf32> to vector<8x128xf32>
      %127 = vector.extract_strided_slice %97 {offsets = [0, 640], sizes = [8, 128], strides = [1, 1]} : vector<8x768xf32> to vector<8x128xf32>
      %c0_53 = arith.constant 0 : index
      %c0_54 = arith.constant 0 : index
      %128 = vector.load %arg9[%c0_53, %c0_54] : memref<1x128xf32, #tpu.memory_space<vmem>>, vector<1x128xf32>
      %129 = vector.broadcast %128 : vector<1x128xf32> to vector<8x128xf32>
      %130 = arith.addf %127, %129 : vector<8x128xf32>
      %131 = arith.mulf %116, %130 : vector<8x128xf32>
      %132 = arith.addf %126, %131 : vector<8x128xf32>
      %133 = math.tanh %132 : vector<8x128xf32>
      %cst_55 = arith.constant 1.000000e+00 : f32
      %134 = vector.broadcast %cst_55 : f32 to vector<8x128xf32>
      %135 = arith.subf %134, %115 : vector<8x128xf32>
      %136 = arith.mulf %135, %125 : vector<8x128xf32>
      %137 = vector.extract_strided_slice %85 {offsets = [0, 0], sizes = [8, 128], strides = [1, 1]} : vector<8x256xf32> to vector<8x128xf32>
      %138 = arith.mulf %115, %137 : vector<8x128xf32>
      %139 = arith.addf %136, %138 : vector<8x128xf32>
      %cst_56 = arith.constant 1.000000e+00 : f32
      %140 = vector.broadcast %cst_56 : f32 to vector<8x128xf32>
      %141 = arith.subf %140, %117 : vector<8x128xf32>
      %142 = arith.mulf %141, %133 : vector<8x128xf32>
      %143 = vector.extract_strided_slice %85 {offsets = [0, 128], sizes = [8, 128], strides = [1, 1]} : vector<8x256xf32> to vector<8x128xf32>
      %144 = arith.mulf %117, %143 : vector<8x128xf32>
      %145 = arith.addf %142, %144 : vector<8x128xf32>
      %146 = tpu.concatenate %139, %145 in 1 : vector<8x128xf32>, vector<8x128xf32> -> vector<8x256xf32>
      scf.yield %146 : vector<8x256xf32>
    }
    %c4_i32_20 = arith.constant 4 : i32
    %c0_21 = arith.constant 0 : index
    %c0_22 = arith.constant 0 : index
    %20 = vector.load %arg15[%c0_21, %c0_22] : memref<8x256xf32, #tpu.memory_space<vmem>>, vector<8x256xf32>
    tpu.vector_store %arg15[%c0_21, %c0_22], %19 {strides = array<i32>} : memref<8x256xf32, #tpu.memory_space<vmem>>, vector<8x256xf32>,
    %c0_i32_23 = arith.constant 0 : i32
    %21 = arith.cmpi eq, %arg0, %c0_i32_23 : i32
    %22 = arith.extui %21 : i1 to i32
    %c0_i32_24 = arith.constant 0 : i32
    %23 = arith.cmpi ne, %22, %c0_i32_24 : i32
    scf.if %23 {
      %c0_25 = arith.constant 0 : index
      %c0_26 = arith.constant 0 : index
      %24 = vector.load %arg10[%c0_25, %c0_26] : memref<256x128xf32, #tpu.memory_space<vmem>>, vector<256x128xf32>
      %cst_27 = arith.constant dense<0.000000e+00> : vector<8x128xf32>
      %25 = tpu.matmul %19, %24, %cst_27 {dimension_numbers = #tpu.dot_dimension_numbers<[1], [0], [0], [1], [0, 0, 1, 1], [], []>} : vector<8x256xf32>, vector<256x128xf32>, vector<8x128xf32> -> vector<8x128xf32>
      %c0_28 = arith.constant 0 : index
      %c0_29 = arith.constant 0 : index
      %26 = vector.load %arg11[%c0_28, %c0_29] : memref<1x128xf32, #tpu.memory_space<vmem>>, vector<1x128xf32>
      %27 = vector.broadcast %26 : vector<1x128xf32> to vector<8x128xf32>
      %28 = arith.addf %25, %27 : vector<8x128xf32>
      %c0_30 = arith.constant 0 : index
      %c0_31 = arith.constant 0 : index
      %29 = vector.load %arg12[%c0_30, %c0_31] : memref<8x128xf32, #tpu.memory_space<vmem>>, vector<8x128xf32>
      tpu.vector_store %arg12[%c0_30, %c0_31], %28 {strides = array<i32>} : memref<8x128xf32, #tpu.memory_space<vmem>>, vector<8x128xf32>,
    } else {
    }
    return
  }
  func.func @transform_0(%arg0: i32) -> (i32, i32) {
    %c0_i32 = arith.constant 0 : i32
    %c0_i32_0 = arith.constant 0 : i32
    return %arg0, %c0_i32 : i32, i32
  }
  func.func @transform_1(%arg0: i32) -> (i32, i32) {
    %c0_i32 = arith.constant 0 : i32
    %0 = arith.subi %c0_i32, %arg0 : i32
    %c0_i32_0 = arith.constant 0 : i32
    %c0_i32_1 = arith.constant 0 : i32
    return %0, %c0_i32_0 : i32, i32
  }
  func.func @transform_2(%arg0: i32) -> (i32, i32) {
    %c0_i32 = arith.constant 0 : i32
    %c0_i32_0 = arith.constant 0 : i32
    %c0_i32_1 = arith.constant 0 : i32
    return %c0_i32, %c0_i32_0 : i32, i32
  }
  func.func @transform_3(%arg0: i32) -> (i32, i32) {
    %c0_i32 = arith.constant 0 : i32
    %c0_i32_0 = arith.constant 0 : i32
    %c0_i32_1 = arith.constant 0 : i32
    return %c0_i32, %c0_i32_0 : i32, i32
  }
  func.func @transform_4(%arg0: i32) -> (i32, i32) {
    %c0_i32 = arith.constant 0 : i32
    %c0_i32_0 = arith.constant 0 : i32
    %c0_i32_1 = arith.constant 0 : i32
    return %c0_i32, %c0_i32_0 : i32, i32
  }
  func.func @transform_5(%arg0: i32) -> (i32, i32) {
    %c0_i32 = arith.constant 0 : i32
    %c0_i32_0 = arith.constant 0 : i32
    %c0_i32_1 = arith.constant 0 : i32
    return %c0_i32, %c0_i32_0 : i32, i32
  }
  func.func @transform_6(%arg0: i32) -> (i32, i32) {
    %c0_i32 = arith.constant 0 : i32
    %c0_i32_0 = arith.constant 0 : i32
    %c0_i32_1 = arith.constant 0 : i32
    return %c0_i32, %c0_i32_0 : i32, i32
  }
  func.func @transform_7(%arg0: i32) -> (i32, i32) {
    %c0_i32 = arith.constant 0 : i32
    %c0_i32_0 = arith.constant 0 : i32
    %c0_i32_1 = arith.constant 0 : i32
    return %c0_i32, %c0_i32_0 : i32, i32
  }
  func.func @transform_8(%arg0: i32) -> (i32, i32) {
    %c0_i32 = arith.constant 0 : i32
    %c0_i32_0 = arith.constant 0 : i32
    %c0_i32_1 = arith.constant 0 : i32
    return %c0_i32, %c0_i32_0 : i32, i32
  }
  func.func @transform_9(%arg0: i32) -> (i32, i32) {
    %c0_i32 = arith.constant 0 : i32
    %c0_i32_0 = arith.constant 0 : i32
    %c0_i32_1 = arith.constant 0 : i32
    return %c0_i32, %c0_i32_0 : i32, i32
  }
  func.func @transform_10(%arg0: i32) -> (i32, i32) {
    %c0_i32 = arith.constant 0 : i32
    %c0_i32_0 = arith.constant 0 : i32
    %c0_i32_1 = arith.constant 0 : i32
    return %c0_i32, %c0_i32_0 : i32, i32
  }
  func.func @transform_11(%arg0: i32) -> (i32, i32) {
    %c0_i32 = arith.constant 0 : i32
    %c0_i32_0 = arith.constant 0 : i32
    %c0_i32_1 = arith.constant 0 : i32
    return %c0_i32, %c0_i32_0 : i32, i32
  }
}

</mosaic_0001>

<bundles_post_ra>
// kernel: tpu_custom_call.1
= control target key start
LH: loop header
LB: loop body
LE: loop exit
PB: predicated region body
PF: predicated region fallthrough
CT: control target
= control target key end

     0   :  { %16 = vsyncpa [#allocation6], 0  ;;  %s2928_s0 = inlined_call_operand.vmem [shape: f32[64,16], index: 0, kind: input, shape index: {}]   ;;  %s2929_s1 = inlined_call_operand.vmem [shape: f32[64,16], index: 1, kind: input, shape index: {}]   ;;  %s2930_s2 = inlined_call_operand.vmem [shape: f32[16,384], index: 2, kind: input, shape index: {}]   ;;  %s2931_s3 = inlined_call_operand.vmem [shape: f32[16,384], index: 3, kind: input, shape index: {}]   ;;  %s2932_s4 = inlined_call_operand.vmem [shape: f32[1,384], index: 4, kind: input, shape index: {}]   ;;  %s2933_s5 = inlined_call_operand.vmem [shape: f32[1,384], index: 5, kind: input, shape index: {}]   ;;  %s2934_s6 = inlined_call_operand.hbm [shape: f32[256,768], index: 6, kind: input, shape index: {}]   ;;  %s2935_s7 = inlined_call_operand.vmem [shape: f32[1,128], index: 7, kind: input, shape index: {}]   ;;  %s2936_s8 = inlined_call_operand.vmem [shape: f32[1,128], index: 8, kind: input, shape index: {}]   ;;  %s2937_s9 = inlined_call_operand.hbm [shape: f32[256,128], index: 9, kind: input, shape index: {}]   ;;  %s2938_s10 = inlined_call_operand.vmem [shape: f32[1,128], index: 10, kind: input, shape index: {}]   ;;  %s2939_s11 = inlined_call_operand.hbm [shape: f32[8,128], index: 11, kind: output, shape index: {}]  }
   0x1   :  { %17 = vsyncpa [#allocation9], 0 }
   0x2   :  { %18 = vsyncpa [#allocation7], 0  ;;  %s43_s19 = sshll.u32 %s2934_s6, 4  ;;  %s1786_s20 = smov [#allocation5]   ;;  %s44_s19 = int_to_ptr.hbm [resolvable:$true] %s43_s19 }
   0x3   :  { %s45_s21 = sshll.u32 %s1786_s20, 4  ;;  %s60_s24 = sshll.u32 %s2937_s9, 4  ;;  %s46_s21 = int_to_ptr.vmem [resolvable:$true] %s45_s21  ;;  %s61_s24 = int_to_ptr.hbm [resolvable:$true] %s60_s24 }
   0x4   :  { %s1787_s25 = smov 768   ;;  %s1788_s26 = smov 48  }
   0x5   :  { %51 = dma.hbm_to_vmem [thread:$0]  %s44_s19, 24576, %s46_s21, [#allocation6], %s1787_s25, %s1787_s25, %s1788_s26  }
   0x6   :  { %s1789_s27 = smov [#allocation8]   ;;  %s1790_s29 = smov 128  }
   0x7   :  { %s62_s28 = sshll.u32 %s1789_s27, 4  ;;  %s1791_s30 = smov 8   ;;  %s63_s28 = int_to_ptr.vmem [resolvable:$true] %s62_s28 }
   0x8   :  { %68 = dma.hbm_to_vmem [thread:$0]  %s61_s24, 4096, %s63_s28, [#allocation9], %s1790_s29, %s1790_s29, %s1791_s30  }
   0x9   :  { %1768 = dma.done.wait [#allocation6], 24576  }
   0xa   :  { %1769 = vsyncadd [#allocation6], 4294942720 }
   0xb   :  { %1770 = dma.done.wait [#allocation9], 4096  }
   0xc   :  { %1771 = vsyncadd [#allocation9], 4294963200  ;;  %v104_v0 = vld [vmem:[%s2930_s2 + $0x18] sm:$0xff]  ;;  %v105_v1 = vld [vmem:[%s2930_s2 + $0x20] sm:$0xff]  ;;  %vm115_vm0 = vcmask 130048  }
   0xd   :  { %v101_v2 = vld [vmem:[%s2930_s2] sm:$0xff]  ;;  %1605 = vmatpush.msra.mxu2 %v104_v0  ;;  %1607 = vmatpush.msra.mxu3 %v105_v1  ;;  %v102_v3 = vld [vmem:[%s2930_s2 + $0x8] sm:$0xff]  ;;  %v298_v6 = vld [vmem:[%s2931_s3 + $0x18] sm:$0xff] }
   0xe   :  { %v1874_v4 = vld [vmem:[%s2928_s0 + $0x20] sm:$0xff]  ;;  %v106_v5 = vld [vmem:[%s2930_s2 + $0x28] sm:$0xff]  ;;  %154 = vmatpush.msra.mxu0 %v104_v0  ;;  %195 = vmatpush.msra.mxu1 %v105_v1  ;;  %v103_v10 = vld [vmem:[%s2930_s2 + $0x10] sm:$0xff] }
   0xf   :  { %1606 = vmatpush.msra.mxu2 %v101_v2  ;;  %1608 = vmatpush.msra.mxu3 %v102_v3  ;;  %v93_v7 = vld [vmem:[%s2928_s0] sm:$0xff]  ;;  %v300_v9 = vld [vmem:[%s2931_s3 + $0x28] sm:$0xff]  ;;  %v297_v13 = vld [vmem:[%s2931_s3 + $0x10] sm:$0xff] }
  0x10   :  { %1537 = vmatmul.msk.f32.vlgmr.msra.gmra.mxu2 %vm115_vm0, %v1874_v4  ;;  %1545 = vmatmul.msk.f32.vlgmr.msra.gmra.mxu3 %vm115_vm0, %v1874_v4  ;;  %v299_v8 = vld [vmem:[%s2931_s3 + $0x20] sm:$0xff]  ;;  %v296_v12 = vld [vmem:[%s2931_s3 + $0x8] sm:$0xff]  ;;  %v99_v16 = vld [vmem:[%s2928_s0 + $0x30] sm:$0xff] }
  0x11   :  { %236 = vmatpush.msrb.mxu2 %v106_v5  ;;  %347 = vmatpush.msrb.mxu3 %v298_v6  ;;  %v295_v11 = vld [vmem:[%s2931_s3] sm:$0xff]  ;;  %v98_v14 = vld [vmem:[%s2928_s0 + $0x28] sm:$0xff]  ;;  %v95_v17 = vld [vmem:[%s2928_s0 + $0x10] sm:$0xff] }
  0x12   :  { %155 = vmatpush.msra.mxu0 %v101_v2  ;;  %196 = vmatpush.msra.mxu1 %v102_v3  ;;  %v94_v15 = vld [vmem:[%s2928_s0 + $0x8] sm:$0xff]  ;;  %v100_v18 = vld [vmem:[%s2928_s0 + $0x38] sm:$0xff]  ;;  %v287_v20 = vld [vmem:[%s2929_s1] sm:$0xff] }
  0x13   :  { %1533 = vmatmul.msk.f32.vlgmr.msra.gmra.mxu0 %vm115_vm0, %v93_v7  ;;  %1541 = vmatmul.msk.f32.vlgmr.msra.gmra.mxu1 %vm115_vm0, %v93_v7  ;;  %v96_v19 = vld [vmem:[%s2928_s0 + $0x18] sm:$0xff]  ;;  %v288_v21 = vld [vmem:[%s2929_s1 + $0x8] sm:$0xff]  ;;  %v289_v22 = vld [vmem:[%s2929_s1 + $0x10] sm:$0xff] }
  0x14   :  { %388 = vmatpush.msrb.mxu0 %v299_v8  ;;  %429 = vmatpush.msrb.mxu1 %v300_v9  ;;  %v290_v23 = vld [vmem:[%s2929_s1 + $0x18] sm:$0xff]  ;;  %v291_v24 = vld [vmem:[%s2929_s1 + $0x20] sm:$0xff]  ;;  %v292_v25 = vld [vmem:[%s2929_s1 + $0x28] sm:$0xff] }
  0x15   :  { %237 = vmatpush.msrb.mxu2 %v103_v10  ;;  %348 = vmatpush.msrb.mxu3 %v295_v11  ;;  %v293_v26 = vld [vmem:[%s2929_s1 + $0x30] sm:$0xff]  ;;  %v294_v27 = vld [vmem:[%s2929_s1 + $0x38] sm:$0xff]  ;;  %v107_v28 = vld [vmem:[%s2932_s4] sm:$0x7] }
  0x16   :  { %389 = vmatpush.msrb.mxu0 %v296_v12  ;;  %430 = vmatpush.msrb.mxu1 %v297_v13  ;;  %v109_v29 = vperm.slane %v107_v28, 0  ;;  %v110_v30 = vperm.slane %v107_v28, 1  ;;  %v301_v59 = vld [vmem:[%s2933_s5] sm:$0x7]  ;;  %v2006_v2 = vperm.slane %v107_v28, 2  ;;  %s2046_s5 = smov 0  }
  0x17   :  { %v2002_v0 = vperm.slane %v301_v59, 1  ;;  %v2004_v1 = vperm.slane %v301_v59, 2  ;;  %v2008_v3 = vperm.slane %v301_v59, 0 }
  0x18   :  { %1538 = vmatmul.msk.f32.gmra.mxu2 %vm115_vm0, %v98_v14  ;;  %1546 = vmatmul.msk.f32.gmra.mxu3 %vm115_vm0, %v98_v14 }
  0x1b   :  { %1534 = vmatmul.msk.f32.gmra.mxu0 %vm115_vm0, %v94_v15  ;;  %1542 = vmatmul.msk.f32.gmra.mxu1 %vm115_vm0, %v94_v15 }
  0x20   :  { %1539 = vmatmul.msk.f32.gmra.mxu2 %vm115_vm0, %v99_v16  ;;  %1547 = vmatmul.msk.f32.gmra.mxu3 %vm115_vm0, %v99_v16 }
  0x23   :  { %1535 = vmatmul.msk.f32.gmra.mxu0 %vm115_vm0, %v95_v17  ;;  %1543 = vmatmul.msk.f32.gmra.mxu1 %vm115_vm0, %v95_v17 }
  0x28   :  { %1540 = vmatmul.msk.f32.gmra.mxu2 %vm115_vm0, %v100_v18  ;;  %1548 = vmatmul.msk.f32.gmra.mxu3 %vm115_vm0, %v100_v18 }
  0x2b   :  { %1536 = vmatmul.msk.f32.gmra.mxu0 %vm115_vm0, %v96_v19  ;;  %1544 = vmatmul.msk.f32.gmra.mxu1 %vm115_vm0, %v96_v19 }
  0x30   :  { %1549 = vmatmul.msk.f32.vlgmr.msrb.gmra.mxu2 %vm115_vm0, %v93_v7  ;;  %1557 = vmatmul.msk.f32.vlgmr.msrb.gmra.mxu3 %vm115_vm0, %v287_v20 }
  0x33   :  { %1565 = vmatmul.msk.f32.vlgmr.msrb.gmra.mxu0 %vm115_vm0, %v287_v20  ;;  %1573 = vmatmul.msk.f32.vlgmr.msrb.gmra.mxu1 %vm115_vm0, %v287_v20 }
  0x38   :  { %1550 = vmatmul.msk.f32.gmra.mxu2 %vm115_vm0, %v94_v15  ;;  %1558 = vmatmul.msk.f32.gmra.mxu3 %vm115_vm0, %v288_v21 }
  0x3b   :  { %1566 = vmatmul.msk.f32.gmra.mxu0 %vm115_vm0, %v288_v21  ;;  %1574 = vmatmul.msk.f32.gmra.mxu1 %vm115_vm0, %v288_v21 }
  0x40   :  { %1551 = vmatmul.msk.f32.gmra.mxu2 %vm115_vm0, %v95_v17  ;;  %1559 = vmatmul.msk.f32.gmra.mxu3 %vm115_vm0, %v289_v22 }
  0x43   :  { %1567 = vmatmul.msk.f32.gmra.mxu0 %vm115_vm0, %v289_v22  ;;  %1575 = vmatmul.msk.f32.gmra.mxu1 %vm115_vm0, %v289_v22 }
  0x48   :  { %1552 = vmatmul.msk.f32.gmra.mxu2 %vm115_vm0, %v96_v19  ;;  %1560 = vmatmul.msk.f32.gmra.mxu3 %vm115_vm0, %v290_v23 }
  0x4b   :  { %1568 = vmatmul.msk.f32.gmra.mxu0 %vm115_vm0, %v290_v23  ;;  %1576 = vmatmul.msk.f32.gmra.mxu1 %vm115_vm0, %v290_v23 }
  0x50   :  { %1553 = vmatmul.msk.f32.gmra.mxu2 %vm115_vm0, %v1874_v4  ;;  %1561 = vmatmul.msk.f32.gmra.mxu3 %vm115_vm0, %v291_v24 }
  0x53   :  { %1569 = vmatmul.msk.f32.gmra.mxu0 %vm115_vm0, %v291_v24  ;;  %1577 = vmatmul.msk.f32.gmra.mxu1 %vm115_vm0, %v291_v24 }
  0x58   :  { %1554 = vmatmul.msk.f32.gmra.mxu2 %vm115_vm0, %v98_v14  ;;  %1562 = vmatmul.msk.f32.gmra.mxu3 %vm115_vm0, %v292_v25 }
  0x5b   :  { %1570 = vmatmul.msk.f32.gmra.mxu0 %vm115_vm0, %v292_v25  ;;  %1578 = vmatmul.msk.f32.gmra.mxu1 %vm115_vm0, %v292_v25 }
  0x60   :  { %1555 = vmatmul.msk.f32.gmra.mxu2 %vm115_vm0, %v99_v16  ;;  %1563 = vmatmul.msk.f32.gmra.mxu3 %vm115_vm0, %v293_v26 }
  0x63   :  { %1571 = vmatmul.msk.f32.gmra.mxu0 %vm115_vm0, %v293_v26  ;;  %1579 = vmatmul.msk.f32.gmra.mxu1 %vm115_vm0, %v293_v26 }
  0x68   :  { %1556 = vmatmul.msk.f32.gmra.mxu2 %vm115_vm0, %v100_v18  ;;  %1564 = vmatmul.msk.f32.gmra.mxu3 %vm115_vm0, %v294_v27 }
  0x6b   :  { %1572 = vmatmul.msk.f32.gmra.mxu0 %vm115_vm0, %v294_v27  ;;  %1580 = vmatmul.msk.f32.gmra.mxu1 %vm115_vm0, %v294_v27 }
  0x90   :  { %v157_v31 = vpop.f32.mrf.mxu0  ;;  %v198_v32 = vpop.f32.mrf.mxu1 }
  0x91   :  { %v158_v33 = vadd.f32 %v157_v31, %v109_v29  ;;  %v199_v34 = vadd.f32 %v198_v32, %v110_v30 }
  0x93   :  { %263 = vst [vmem:[#allocation2] sm:$0xff] %v158_v33  ;;  %v169_v35 = vpop.f32.mrf.mxu2  ;;  %v210_v36 = vpop.f32.mrf.mxu3 }
  0x94   :  { %v170_v37 = vadd.f32 %v169_v35, %v109_v29  ;;  %264 = vst [vmem:[#allocation2 + $0x8] sm:$0xff] %v199_v34  ;;  %v211_v38 = vadd.f32 %v210_v36, %v110_v30 }
  0x96   :  { %275 = vst [vmem:[#allocation2 + $0x60] sm:$0xff] %v170_v37 }
  0x97   :  { %276 = vst [vmem:[#allocation2 + $0x68] sm:$0xff] %v211_v38 }
  0x98   :  { %v160_v39 = vpop.f32.mrf.mxu0  ;;  %v201_v40 = vpop.f32.mrf.mxu1 }
  0x99   :  { %v161_v41 = vadd.f32 %v160_v39, %v109_v29  ;;  %v202_v42 = vadd.f32 %v201_v40, %v110_v30 }
  0x9b   :  { %266 = vst [vmem:[#allocation2 + $0x18] sm:$0xff] %v161_v41  ;;  %v172_v43 = vpop.f32.mrf.mxu2  ;;  %v213_v44 = vpop.f32.mrf.mxu3 }
  0x9c   :  { %v173_v45 = vadd.f32 %v172_v43, %v109_v29  ;;  %267 = vst [vmem:[#allocation2 + $0x20] sm:$0xff] %v202_v42  ;;  %v214_v46 = vadd.f32 %v213_v44, %v110_v30 }
  0x9e   :  { %278 = vst [vmem:[#allocation2 + $0x78] sm:$0xff] %v173_v45 }
  0x9f   :  { %279 = vst [vmem:[#allocation2 + $0x80] sm:$0xff] %v214_v46 }
  0xa0   :  { %v163_v47 = vpop.f32.mrf.mxu0  ;;  %v204_v48 = vpop.f32.mrf.mxu1 }
  0xa1   :  { %v164_v49 = vadd.f32 %v163_v47, %v109_v29  ;;  %v205_v50 = vadd.f32 %v204_v48, %v110_v30 }
  0xa3   :  { %269 = vst [vmem:[#allocation2 + $0x30] sm:$0xff] %v164_v49  ;;  %v175_v51 = vpop.f32.mrf.mxu2  ;;  %v216_v52 = vpop.f32.mrf.mxu3 }
  0xa4   :  { %v176_v53 = vadd.f32 %v175_v51, %v109_v29  ;;  %270 = vst [vmem:[#allocation2 + $0x38] sm:$0xff] %v205_v50  ;;  %v217_v54 = vadd.f32 %v216_v52, %v110_v30 }
  0xa6   :  { %281 = vst [vmem:[#allocation2 + $0x90] sm:$0xff] %v176_v53 }
  0xa7   :  { %282 = vst [vmem:[#allocation2 + $0x98] sm:$0xff] %v217_v54 }
  0xa8   :  { %v166_v55 = vpop.f32.mrf.mxu0  ;;  %v207_v56 = vpop.f32.mrf.mxu1 }
  0xa9   :  { %v167_v57 = vadd.f32 %v166_v55, %v109_v29  ;;  %v208_v58 = vadd.f32 %v207_v56, %v110_v30 }
  0xab   :  { %272 = vst [vmem:[#allocation2 + $0x48] sm:$0xff] %v167_v57  ;;  %v178_v60 = vpop.f32.mrf.mxu2  ;;  %v219_v61 = vpop.f32.mrf.mxu3 }
  0xac   :  { %v179_v62 = vadd.f32 %v178_v60, %v109_v29  ;;  %273 = vst [vmem:[#allocation2 + $0x50] sm:$0xff] %v208_v58  ;;  %v220_v63 = vadd.f32 %v219_v61, %v110_v30 }
  0xae   :  { %284 = vst [vmem:[#allocation2 + $0xa8] sm:$0xff] %v179_v62 }
  0xaf   :  { %285 = vst [vmem:[#allocation2 + $0xb0] sm:$0xff] %v220_v63 }
  0xb0   :  { %v391_v4 = vpop.f32.mrf.mxu0  ;;  %v432_v5 = vpop.f32.mrf.mxu1 }
  0xb1   :  { %v392_v6 = vadd.f32 %v391_v4, %v2002_v0  ;;  %v433_v7 = vadd.f32 %v432_v5, %v2004_v1 }
  0xb3   :  { %v239_v8 = vpop.f32.mrf.mxu2  ;;  %v350_v9 = vpop.f32.mrf.mxu3  ;;  %457 = vst [vmem:[#allocation3 + $0x8] sm:$0xff] %v392_v6 }
  0xb4   :  { %v240_v10 = vadd.f32 %v239_v8, %v2006_v2  ;;  %v351_v11 = vadd.f32 %v350_v9, %v2008_v3  ;;  %458 = vst [vmem:[#allocation3 + $0x10] sm:$0xff] %v433_v7  ;;  %v2042_v8 = vmov 0.0   ;;  %v2044_v9 = vmov 0.0  }
  0xb6   :  { %265 = vst [vmem:[#allocation2 + $0x10] sm:$0xff] %v240_v10 }
  0xb7   :  { %456 = vst [vmem:[#allocation3] sm:$0xff] %v351_v11 }
  0xb8   :  { %v394_v12 = vpop.f32.mrf.mxu0  ;;  %v435_v13 = vpop.f32.mrf.mxu1 }
  0xb9   :  { %v395_v14 = vadd.f32 %v394_v12, %v2002_v0  ;;  %v436_v15 = vadd.f32 %v435_v13, %v2004_v1 }
  0xbb   :  { %v242_v16 = vpop.f32.mrf.mxu2  ;;  %v353_v17 = vpop.f32.mrf.mxu3  ;;  %460 = vst [vmem:[#allocation3 + $0x20] sm:$0xff] %v395_v14 }
  0xbc   :  { %v243_v18 = vadd.f32 %v242_v16, %v2006_v2  ;;  %v354_v19 = vadd.f32 %v353_v17, %v2008_v3  ;;  %461 = vst [vmem:[#allocation3 + $0x28] sm:$0xff] %v436_v15 }
  0xbe   :  { %268 = vst [vmem:[#allocation2 + $0x28] sm:$0xff] %v243_v18 }
  0xbf   :  { %459 = vst [vmem:[#allocation3 + $0x18] sm:$0xff] %v354_v19 }
  0xc0   :  { %v397_v20 = vpop.f32.mrf.mxu0  ;;  %v438_v21 = vpop.f32.mrf.mxu1 }
  0xc1   :  { %v398_v22 = vadd.f32 %v397_v20, %v2002_v0  ;;  %v439_v23 = vadd.f32 %v438_v21, %v2004_v1 }
  0xc3   :  { %v245_v24 = vpop.f32.mrf.mxu2  ;;  %v356_v25 = vpop.f32.mrf.mxu3  ;;  %463 = vst [vmem:[#allocation3 + $0x38] sm:$0xff] %v398_v22 }
  0xc4   :  { %v246_v26 = vadd.f32 %v245_v24, %v2006_v2  ;;  %v357_v27 = vadd.f32 %v356_v25, %v2008_v3  ;;  %464 = vst [vmem:[#allocation3 + $0x40] sm:$0xff] %v439_v23 }
  0xc6   :  { %271 = vst [vmem:[#allocation2 + $0x40] sm:$0xff] %v246_v26 }
  0xc7   :  { %462 = vst [vmem:[#allocation3 + $0x30] sm:$0xff] %v357_v27 }
  0xc8   :  { %v400_v28 = vpop.f32.mrf.mxu0  ;;  %v441_v29 = vpop.f32.mrf.mxu1 }
  0xc9   :  { %v401_v30 = vadd.f32 %v400_v28, %v2002_v0  ;;  %v442_v31 = vadd.f32 %v441_v29, %v2004_v1 }
  0xcb   :  { %v248_v32 = vpop.f32.mrf.mxu2  ;;  %v359_v33 = vpop.f32.mrf.mxu3  ;;  %466 = vst [vmem:[#allocation3 + $0x50] sm:$0xff] %v401_v30 }
  0xcc   :  { %v249_v34 = vadd.f32 %v248_v32, %v2006_v2  ;;  %v360_v35 = vadd.f32 %v359_v33, %v2008_v3  ;;  %467 = vst [vmem:[#allocation3 + $0x58] sm:$0xff] %v442_v31 }
  0xce   :  { %274 = vst [vmem:[#allocation2 + $0x58] sm:$0xff] %v249_v34 }
  0xcf   :  { %465 = vst [vmem:[#allocation3 + $0x48] sm:$0xff] %v360_v35 }
  0xd0   :  { %v403_v36 = vpop.f32.mrf.mxu0  ;;  %v444_v37 = vpop.f32.mrf.mxu1 }
  0xd1   :  { %v404_v38 = vadd.f32 %v403_v36, %v2002_v0  ;;  %v445_v39 = vadd.f32 %v444_v37, %v2004_v1 }
  0xd3   :  { %v251_v40 = vpop.f32.mrf.mxu2  ;;  %v362_v41 = vpop.f32.mrf.mxu3  ;;  %469 = vst [vmem:[#allocation3 + $0x68] sm:$0xff] %v404_v38 }
  0xd4   :  { %v252_v42 = vadd.f32 %v251_v40, %v2006_v2  ;;  %v363_v43 = vadd.f32 %v362_v41, %v2008_v3  ;;  %470 = vst [vmem:[#allocation3 + $0x70] sm:$0xff] %v445_v39 }
  0xd6   :  { %277 = vst [vmem:[#allocation2 + $0x70] sm:$0xff] %v252_v42 }
  0xd7   :  { %468 = vst [vmem:[#allocation3 + $0x60] sm:$0xff] %v363_v43 }
  0xd8   :  { %v406_v44 = vpop.f32.mrf.mxu0  ;;  %v447_v45 = vpop.f32.mrf.mxu1 }
  0xd9   :  { %v407_v46 = vadd.f32 %v406_v44, %v2002_v0  ;;  %v448_v47 = vadd.f32 %v447_v45, %v2004_v1 }
  0xdb   :  { %v254_v48 = vpop.f32.mrf.mxu2  ;;  %v365_v49 = vpop.f32.mrf.mxu3  ;;  %472 = vst [vmem:[#allocation3 + $0x80] sm:$0xff] %v407_v46 }
  0xdc   :  { %v255_v50 = vadd.f32 %v254_v48, %v2006_v2  ;;  %v366_v51 = vadd.f32 %v365_v49, %v2008_v3  ;;  %473 = vst [vmem:[#allocation3 + $0x88] sm:$0xff] %v448_v47 }
  0xde   :  { %280 = vst [vmem:[#allocation2 + $0x88] sm:$0xff] %v255_v50 }
  0xdf   :  { %471 = vst [vmem:[#allocation3 + $0x78] sm:$0xff] %v366_v51 }
  0xe0   :  { %v409_v52 = vpop.f32.mrf.mxu0  ;;  %v450_v53 = vpop.f32.mrf.mxu1 }
  0xe1   :  { %v410_v54 = vadd.f32 %v409_v52, %v2002_v0  ;;  %v451_v55 = vadd.f32 %v450_v53, %v2004_v1 }
  0xe3   :  { %v257_v56 = vpop.f32.mrf.mxu2  ;;  %v368_v57 = vpop.f32.mrf.mxu3  ;;  %475 = vst [vmem:[#allocation3 + $0x98] sm:$0xff] %v410_v54 }
  0xe4   :  { %v258_v58 = vadd.f32 %v257_v56, %v2006_v2  ;;  %v369_v59 = vadd.f32 %v368_v57, %v2008_v3  ;;  %476 = vst [vmem:[#allocation3 + $0xa0] sm:$0xff] %v451_v55 }
  0xe6   :  { %283 = vst [vmem:[#allocation2 + $0xa0] sm:$0xff] %v258_v58 }
  0xe7   :  { %474 = vst [vmem:[#allocation3 + $0x90] sm:$0xff] %v369_v59 }
  0xe8   :  { %v412_v60 = vpop.f32.mrf.mxu0  ;;  %v453_v61 = vpop.f32.mrf.mxu1 }
  0xe9   :  { %v413_v62 = vadd.f32 %v412_v60, %v2002_v0  ;;  %v454_v63 = vadd.f32 %v453_v61, %v2004_v1 }
  0xeb   :  { %v260_v4 = vpop.f32.mrf.mxu2  ;;  %v371_v5 = vpop.f32.mrf.mxu3  ;;  %478 = vst [vmem:[#allocation3 + $0xb0] sm:$0xff] %v413_v62 }
  0xec   :  { %v261_v6 = vadd.f32 %v260_v4, %v2006_v2  ;;  %v372_v7 = vadd.f32 %v371_v5, %v2008_v3  ;;  %479 = vst [vmem:[#allocation3 + $0xb8] sm:$0xff] %v454_v63 }
  0xee   :  { %286 = vst [vmem:[#allocation2 + $0xb8] sm:$0xff] %v261_v6 }
  0xef   :  { %477 = vst [vmem:[#allocation3 + $0xa8] sm:$0xff] %v372_v7 }
  0xf0 LB: > { %v2057_v0 = vld [vmem:[#allocation5 + $0x2d0] sm:$0xff]  ;;  %v2061_v2 = vld [vmem:[#allocation5 + $0x2d8] sm:$0xff]  ;;  %v2067_v10 = vld [vmem:[#allocation5 + $0x2a0] sm:$0xff]  ;;  %s1582_s21 = sshll.u32 %s1784_s5, 4  ;;  %s1581_s25 = sshll.u32 %s1784_s5, 1  ;;  %s1784_s5 = sphi %s2046_s5, %s493_s5   ;;  %v1780_v9 = vphi %v2044_v9, %v3335_v9   ;;  %v1776_v8 = vphi %v2042_v8, %v3334_v8  }
  0xf1   : > { %v2059_v1 = vld [vmem:[#allocation5 + $0x5d0] sm:$0xff]  ;;  %708 = vmatpush.msra.mxu0 %v2057_v0  ;;  %v2065_v3 = vld [vmem:[#allocation5 + $0x5d8] sm:$0xff]  ;;  %v2069_v11 = vld [vmem:[#allocation5 + $0x5a0] sm:$0xff]  ;;  %748 = vmatpush.msra.mxu2 %v2061_v2  ;;  %s500_s22 = sshra.s32 %s1582_s21, 3  ;;  %s498_s26 = ssub.s32 7, %s1581_s25 }
  0xf2   : > { %728 = vmatpush.msra.mxu1 %v2059_v1  ;;  %768 = vmatpush.msra.mxu3 %v2065_v3  ;;  %v2073_v12 = vld [vmem:[#allocation5 + $0x2a8] sm:$0xff]  ;;  %v2077_v14 = vld [vmem:[#allocation5 + $0x270] sm:$0xff]  ;;  %v2083_v16 = vld [vmem:[#allocation5 + $0x278] sm:$0xff]  ;;  %s1598_s23 = smul.u32 24, %s500_s22  ;;  %s1583_s27 = sshll.u32 %s498_s26, 3 }
  0xf3   : > { %v2075_v13 = vld [vmem:[#allocation5 + $0x5a8] sm:$0xff]  ;;  %709 = vmatpush.msra.mxu0 %v2067_v10  ;;  %v2081_v15 = vld [vmem:[#allocation5 + $0x570] sm:$0xff]  ;;  %v2085_v17 = vld [vmem:[#allocation5 + $0x578] sm:$0xff]  ;;  %749 = vmatpush.msra.mxu2 %v2073_v12  ;;  %s508_s30 = sshra.s32 %s1583_s27, 3  ;;  %s1601_s9 = sadd.s32 8, %s1582_s21 }
  0xf4   : > { %729 = vmatpush.msra.mxu1 %v2069_v11  ;;  %769 = vmatpush.msra.mxu3 %v2075_v13  ;;  %v2089_v18 = vld [vmem:[#allocation5 + $0x240] sm:$0xff]  ;;  %v2095_v20 = vld [vmem:[#allocation5 + $0x248] sm:$0xff]  ;;  %v2101_v22 = vld [vmem:[#allocation5 + $0x210] sm:$0xff]  ;;  %s2766_s24 = scalar_lea.vmem [#allocation2], %s1598_s23  ;;  %s1599_s0 = smul.u32 24, %s508_s30 }
  0xf5   : > { %v2091_v19 = vld [vmem:[#allocation5 + $0x540] sm:$0xff]  ;;  %710 = vmatpush.msra.mxu0 %v2077_v14  ;;  %v2097_v21 = vld [vmem:[#allocation5 + $0x548] sm:$0xff]  ;;  %750 = vmatpush.msra.mxu2 %v2083_v16  ;;  %v2103_v23 = vld [vmem:[#allocation5 + $0x510] sm:$0xff]  ;;  %s1056_s14 = sshra.s32 %s1601_s9, 3  ;;  %s1054_s16 = ssub.s32 6, %s1581_s25 }
  0xf6   : > { %730 = vmatpush.msra.mxu1 %v2081_v15  ;;  %770 = vmatpush.msra.mxu3 %v2085_v17  ;;  %v2107_v24 = vld [vmem:[#allocation5 + $0x218] sm:$0xff]  ;;  %v2113_v26 = vld [vmem:[#allocation5 + $0x1e0] sm:$0xff]  ;;  %v2119_v28 = vld [vmem:[#allocation5 + $0x1e8] sm:$0xff]  ;;  %s2790_s6 = scalar_lea.vmem [#allocation3], %s1599_s0  ;;  %s1602_s15 = smul.u32 24, %s1056_s14 }
  0xf7   : > { %711 = vmatpush.msra.mxu0 %v2089_v18  ;;  %v2109_v25 = vld [vmem:[#allocation5 + $0x518] sm:$0xff]  ;;  %751 = vmatpush.msra.mxu2 %v2095_v20  ;;  %v2115_v27 = vld [vmem:[#allocation5 + $0x4e0] sm:$0xff]  ;;  %v2121_v29 = vld [vmem:[#allocation5 + $0x4e8] sm:$0xff]  ;;  %s1591_s2 = sshll.u32 %s1054_s16, 3  ;;  %s493_s5 = sadd.s32 1, %s1784_s5  }
  0xf8   : > { %731 = vmatpush.msra.mxu1 %v2091_v19  ;;  %771 = vmatpush.msra.mxu3 %v2097_v21  ;;  %v2125_v30 = vld [vmem:[#allocation5 + $0x1b0] sm:$0xff]  ;;  %v2131_v32 = vld [vmem:[#allocation5 + $0x1b8] sm:$0xff]  ;;  %v2137_v34 = vld [vmem:[#allocation5 + $0x180] sm:$0xff]  ;;  %s2893_s17 = scalar_lea.vmem [#allocation2], %s1602_s15  ;;  %s1064_s18 = sshra.s32 %s1591_s2, 3 }
  0xf9   : > { %712 = vmatpush.msra.mxu0 %v2101_v22  ;;  %752 = vmatpush.msra.mxu2 %v2107_v24  ;;  %v2127_v31 = vld [vmem:[#allocation5 + $0x4b0] sm:$0xff]  ;;  %v2133_v33 = vld [vmem:[#allocation5 + $0x4b8] sm:$0xff]  ;;  %v2139_v35 = vld [vmem:[#allocation5 + $0x480] sm:$0xff]  ;;  %s1603_s19 = smul.u32 24, %s1064_s18  ;;  %p490_p0 = scmp.ge.s32.totalorder %s493_s5, 4  }
  0xfa   : > { %732 = vmatpush.msra.mxu1 %v2103_v23  ;;  %772 = vmatpush.msra.mxu3 %v2109_v25  ;;  %v2143_v36 = vld [vmem:[#allocation5 + $0x188] sm:$0xff]  ;;  %v2149_v38 = vld [vmem:[#allocation5 + $0x150] sm:$0xff]  ;;  %v2155_v40 = vld [vmem:[#allocation5 + $0x158] sm:$0xff]  ;;  %s1792_s20 = smov (%p490_p0), [#allocation10]   ;;  %s1497_s21 = sshll.u32 (%p490_p0), %s2939_s11, 4  ;;  %s1498_s21 = int_to_ptr.hbm [resolvable:$true] %s1497_s21 }
  0xfb   : > { %713 = vmatpush.msra.mxu0 %v2113_v26  ;;  %753 = vmatpush.msra.mxu2 %v2119_v28  ;;  %v2145_v37 = vld [vmem:[#allocation5 + $0x488] sm:$0xff]  ;;  %v2151_v39 = vld [vmem:[#allocation5 + $0x450] sm:$0xff]  ;;  %v2157_v41 = vld [vmem:[#allocation5 + $0x458] sm:$0xff]  ;;  %s2897_s3 = scalar_lea.vmem [#allocation3], %s1603_s19  ;;  %s1495_s1 = sshll.u32 (%p490_p0), %s1792_s20, 4  ;;  %s1496_s1 = int_to_ptr.vmem [resolvable:$true] %s1495_s1 }
  0xfc   : > { %733 = vmatpush.msra.mxu1 %v2115_v27  ;;  %773 = vmatpush.msra.mxu3 %v2121_v29  ;;  %v2161_v42 = vld [vmem:[#allocation5 + $0x120] sm:$0xff]  ;;  %v2167_v44 = vld [vmem:[#allocation5 + $0x128] sm:$0xff]  ;;  %v2173_v46 = vld [vmem:[#allocation5 + $0xf0] sm:$0xff] }
  0xfd   : > { %714 = vmatpush.msra.mxu0 %v2125_v30  ;;  %754 = vmatpush.msra.mxu2 %v2131_v32  ;;  %v2163_v43 = vld [vmem:[#allocation5 + $0x420] sm:$0xff]  ;;  %v2169_v45 = vld [vmem:[#allocation5 + $0x428] sm:$0xff]  ;;  %v2175_v47 = vld [vmem:[#allocation5 + $0x3f0] sm:$0xff] }
  0xfe   : > { %734 = vmatpush.msra.mxu1 %v2127_v31  ;;  %774 = vmatpush.msra.mxu3 %v2133_v33  ;;  %v2179_v48 = vld [vmem:[#allocation5 + $0xf8] sm:$0xff]  ;;  %v2185_v50 = vld [vmem:[#allocation5 + $0xc0] sm:$0xff]  ;;  %v2191_v52 = vld [vmem:[#allocation5 + $0xc8] sm:$0xff] }
  0xff   : > { %715 = vmatpush.msra.mxu0 %v2137_v34  ;;  %755 = vmatpush.msra.mxu2 %v2143_v36  ;;  %v2181_v49 = vld [vmem:[#allocation5 + $0x3f8] sm:$0xff]  ;;  %v2187_v51 = vld [vmem:[#allocation5 + $0x3c0] sm:$0xff]  ;;  %v2193_v53 = vld [vmem:[#allocation5 + $0x3c8] sm:$0xff] }
 0x100   : > { %735 = vmatpush.msra.mxu1 %v2139_v35  ;;  %775 = vmatpush.msra.mxu3 %v2145_v37  ;;  %v2197_v54 = vld [vmem:[#allocation5 + $0x90] sm:$0xff]  ;;  %v2203_v56 = vld [vmem:[#allocation5 + $0x98] sm:$0xff]  ;;  %v2209_v58 = vld [vmem:[#allocation5 + $0x60] sm:$0xff] }
 0x101   : > { %716 = vmatpush.msra.mxu0 %v2149_v38  ;;  %756 = vmatpush.msra.mxu2 %v2155_v40  ;;  %v2199_v55 = vld [vmem:[#allocation5 + $0x390] sm:$0xff]  ;;  %v2205_v57 = vld [vmem:[#allocation5 + $0x398] sm:$0xff]  ;;  %3072 = vst [vmem:[#allocation16_spill] sm:$0xff] %v2209_v58  ;;  %v2211_v59 = vld [vmem:[#allocation5 + $0x360] sm:$0xff] }
 0x102   : > { %736 = vmatpush.msra.mxu1 %v2151_v39  ;;  %776 = vmatpush.msra.mxu3 %v2157_v41  ;;  %3070 = vst [vmem:[#allocation14_spill] sm:$0xff] %v2199_v55  ;;  %v2215_v60 = vld [vmem:[#allocation5 + $0x68] sm:$0xff]  ;;  %v2221_v62 = vld [vmem:[#allocation5 + $0x30] sm:$0xff]  ;;  %v2227_v4 = vld [vmem:[#allocation5 + $0x38] sm:$0xff] }
 0x103   : > { %717 = vmatpush.msra.mxu0 %v2161_v42  ;;  %757 = vmatpush.msra.mxu2 %v2167_v44  ;;  %3071 = vst [vmem:[#allocation15_spill] sm:$0xff] %v2205_v57  ;;  %v2217_v61 = vld [vmem:[#allocation5 + $0x368] sm:$0xff]  ;;  %v2223_v63 = vld [vmem:[#allocation5 + $0x330] sm:$0xff]  ;;  %v2229_v5 = vld [vmem:[#allocation5 + $0x338] sm:$0xff] }
 0x104   : > { %737 = vmatpush.msra.mxu1 %v2163_v43  ;;  %777 = vmatpush.msra.mxu3 %v2169_v45  ;;  %3073 = vst [vmem:[#allocation17_spill] sm:$0xff] %v2211_v59  ;;  %v2233_v6 = vld [vmem:[#allocation5] sm:$0xff] }
 0x105   : > { %718 = vmatpush.msra.mxu0 %v2173_v46  ;;  %758 = vmatpush.msra.mxu2 %v2179_v48  ;;  %3074 = vst [vmem:[#allocation18_spill] sm:$0xff] %v2215_v60  ;;  %v2235_v7 = vld [vmem:[#allocation5 + $0x300] sm:$0xff] }
 0x106   : > { %738 = vmatpush.msra.mxu1 %v2175_v47  ;;  %778 = vmatpush.msra.mxu3 %v2181_v49  ;;  %3075 = vst [vmem:[#allocation19_spill] sm:$0xff] %v2217_v61 }
 0x107   : > { %719 = vmatpush.msra.mxu0 %v2185_v50  ;;  %759 = vmatpush.msra.mxu2 %v2191_v52  ;;  %3076 = vst [vmem:[#allocation20_spill] sm:$0xff] %v2221_v62 }
 0x108   : > { %739 = vmatpush.msra.mxu1 %v2187_v51  ;;  %779 = vmatpush.msra.mxu3 %v2193_v53  ;;  %3077 = vst [vmem:[#allocation21_spill] sm:$0xff] %v2223_v63 }
 0x109   : > { %720 = vmatpush.msra.mxu0 %v2197_v54  ;;  %760 = vmatpush.msra.mxu2 %v2203_v56  ;;  %3078 = vst [vmem:[#allocation22_spill] sm:$0xff] %v2227_v4 }
 0x10a   : > { %740 = vmatpush.msra.mxu1 %v2199_v55  ;;  %780 = vmatpush.msra.mxu3 %v2205_v57  ;;  %3079 = vst [vmem:[#allocation23_spill] sm:$0xff] %v2229_v5  ;;  %v2239_v57 = vld [vmem:[#allocation5 + $0x8] sm:$0xff]  ;;  %v2407_v55 = vld [vmem:[#allocation5 + $0x370] sm:$0xff] }
 0x10b   : > { %721 = vmatpush.msra.mxu0 %v2209_v58  ;;  %761 = vmatpush.msra.mxu2 %v2215_v60  ;;  %3080 = vst [vmem:[#allocation24_spill] sm:$0xff] %v2233_v6  ;;  %v2241_v58 = vld [vmem:[#allocation5 + $0x308] sm:$0xff]  ;;  %v2247_v60 = vld [vmem:[#allocation5 + $0x5e0] sm:$0xff] }
 0x10c   : > { %741 = vmatpush.msra.mxu1 %v2211_v59  ;;  %781 = vmatpush.msra.mxu3 %v2217_v61  ;;  %3081 = vst [vmem:[#allocation25_spill] sm:$0xff] %v2235_v7  ;;  %v2245_v59 = vld [vmem:[#allocation5 + $0x2e0] sm:$0xff]  ;;  %v2251_v61 = vld [vmem:[#allocation5 + $0x2e8] sm:$0xff] }
 0x10d   : > { %722 = vmatpush.msra.mxu0 %v2221_v62  ;;  %3082 = vst [vmem:[#allocation26_spill] sm:$0xff] %v2239_v57  ;;  %762 = vmatpush.msra.mxu2 %v2227_v4  ;;  %v2253_v62 = vld [vmem:[#allocation5 + $0x5e8] sm:$0xff]  ;;  %v2259_v4 = vld [vmem:[#allocation5 + $0x5b0] sm:$0xff] }
 0x10e   : > { %742 = vmatpush.msra.mxu1 %v2223_v63  ;;  %3083 = vst [vmem:[#allocation27_spill] sm:$0xff] %v2241_v58  ;;  %782 = vmatpush.msra.mxu3 %v2229_v5  ;;  %v2257_v63 = vld [vmem:[#allocation5 + $0x2b0] sm:$0xff]  ;;  %v2263_v5 = vld [vmem:[#allocation5 + $0x2b8] sm:$0xff] }
 0x10f   : > { %3084 = vst [vmem:[#allocation28_spill] sm:$0xff] %v2245_v59  ;;  %723 = vmatpush.msra.mxu0 %v2233_v6  ;;  %763 = vmatpush.msra.mxu2 %v2239_v57  ;;  %v2265_v6 = vld [vmem:[#allocation5 + $0x5b8] sm:$0xff] }
 0x110   : > { %3085 = vst [vmem:[#allocation29_spill] sm:$0xff] %v2247_v60  ;;  %743 = vmatpush.msra.mxu1 %v2235_v7  ;;  %783 = vmatpush.msra.mxu3 %v2241_v58  ;;  %v2271_v58 = vld [vmem:[#allocation5 + $0x280] sm:$0xff]  ;;  %v2315_v57 = vld [vmem:[#allocation5 + $0x1f8] sm:$0xff] }
 0x111   : > { %3086 = vst [vmem:[#allocation30_spill] sm:$0xff] %v2251_v61  ;;  %788 = vmatpush.msrb.mxu0 %v2245_v59  ;;  %828 = vmatpush.msrb.mxu2 %v2251_v61  ;;  %v2273_v7 = vld [vmem:[#allocation5 + $0x580] sm:$0xff]  ;;  %v2279_v59 = vld [vmem:[#allocation5 + $0x588] sm:$0xff]  ;;  %v2311_v61 = vld [vmem:[#allocation5 + $0x4f0] sm:$0xff] }
 0x112   : > { %3087 = vst [vmem:[#allocation31_spill] sm:$0xff] %v2253_v62  ;;  %808 = vmatpush.msrb.mxu1 %v2247_v60  ;;  %848 = vmatpush.msrb.mxu3 %v2253_v62  ;;  %v2277_v60 = vld [vmem:[#allocation5 + $0x288] sm:$0xff]  ;;  %v2287_v62 = vld [vmem:[#allocation5 + $0x550] sm:$0xff] }
 0x113   : > { %3088 = vst [vmem:[#allocation32_spill] sm:$0xff] %v2257_v63  ;;  %789 = vmatpush.msrb.mxu0 %v2257_v63  ;;  %829 = vmatpush.msrb.mxu2 %v2263_v5  ;;  %v2297_v63 = vld [vmem:[#allocation5 + $0x220] sm:$0xff] }
 0x114   : > { %3089 = vst [vmem:[#allocation33_spill] sm:$0xff] %v2259_v4  ;;  %809 = vmatpush.msrb.mxu1 %v2259_v4  ;;  %849 = vmatpush.msrb.mxu3 %v2265_v6  ;;  %v2285_v4 = vld [vmem:[#allocation5 + $0x250] sm:$0xff] }
 0x115   : > { %3090 = vst [vmem:[#allocation34_spill] sm:$0xff] %v2263_v5  ;;  %724 = vmatmul.f32.vlgmr.msra.gmra.mxu0 %v1780_v9  ;;  %744 = vmatmul.f32.vlgmr.msra.gmra.mxu1 %v1776_v8  ;;  %v2293_v5 = vld [vmem:[#allocation5 + $0x558] sm:$0xff] }
 0x116   : > { %3091 = vst [vmem:[#allocation35_spill] sm:$0xff] %v2265_v6  ;;  %790 = vmatpush.msrb.mxu0 %v2271_v58  ;;  %810 = vmatpush.msrb.mxu1 %v2273_v7  ;;  %v2291_v6 = vld [vmem:[#allocation5 + $0x258] sm:$0xff] }
 0x117   : > { %3092 = vst [vmem:[#allocation36_spill] sm:$0xff] %v2271_v58  ;;  %830 = vmatpush.msrb.mxu2 %v2277_v60  ;;  %850 = vmatpush.msrb.mxu3 %v2279_v59  ;;  %v2299_v58 = vld [vmem:[#allocation5 + $0x520] sm:$0xff] }
 0x118   : > { %3093 = vst [vmem:[#allocation37_spill] sm:$0xff] %v2273_v7  ;;  %764 = vmatmul.f32.vlgmr.msra.gmra.mxu2 %v1780_v9  ;;  %784 = vmatmul.f32.vlgmr.msra.gmra.mxu3 %v1776_v8  ;;  %v2303_v7 = vld [vmem:[#allocation5 + $0x228] sm:$0xff] }
 0x119   : > { %3094 = vst [vmem:[#allocation38_spill] sm:$0xff] %v2277_v60  ;;  %791 = vmatpush.msrb.mxu0 %v2285_v4  ;;  %811 = vmatpush.msrb.mxu1 %v2287_v62  ;;  %v2305_v60 = vld [vmem:[#allocation5 + $0x528] sm:$0xff] }
 0x11a   : > { %3095 = vst [vmem:[#allocation39_spill] sm:$0xff] %v2279_v59  ;;  %831 = vmatpush.msrb.mxu2 %v2291_v6  ;;  %851 = vmatpush.msrb.mxu3 %v2293_v5  ;;  %v2309_v59 = vld [vmem:[#allocation5 + $0x1f0] sm:$0xff] }
 0x11b   : > { %3096 = vst [vmem:[#allocation40_spill] sm:$0xff] %v2285_v4  ;;  %792 = vmatpush.msrb.mxu0 %v2297_v63  ;;  %812 = vmatpush.msrb.mxu1 %v2299_v58  ;;  %v2317_v4 = vld [vmem:[#allocation5 + $0x4f8] sm:$0xff] }
 0x11c   : > { %3097 = vst [vmem:[#allocation41_spill] sm:$0xff] %v2287_v62  ;;  %832 = vmatpush.msrb.mxu2 %v2303_v7  ;;  %852 = vmatpush.msrb.mxu3 %v2305_v60  ;;  %v2321_v62 = vld [vmem:[#allocation5 + $0x1c0] sm:$0xff] }
 0x11d   : > { %3098 = vst [vmem:[#allocation42_spill] sm:$0xff] %v2291_v6  ;;  %v2323_v6 = vld [vmem:[#allocation5 + $0x4c0] sm:$0xff]  ;;  %793 = vmatpush.msrb.mxu0 %v2309_v59  ;;  %813 = vmatpush.msrb.mxu1 %v2311_v61 }
 0x11e   : > { %3099 = vst [vmem:[#allocation43_spill] sm:$0xff] %v2293_v5  ;;  %v2327_v5 = vld [vmem:[#allocation5 + $0x1c8] sm:$0xff]  ;;  %833 = vmatpush.msrb.mxu2 %v2315_v57  ;;  %853 = vmatpush.msrb.mxu3 %v2317_v4 }
 0x11f   : > { %3100 = vst [vmem:[#allocation44_spill] sm:$0xff] %v2297_v63  ;;  %v2329_v63 = vld [vmem:[#allocation5 + $0x4c8] sm:$0xff]  ;;  %794 = vmatpush.msrb.mxu0 %v2321_v62  ;;  %814 = vmatpush.msrb.mxu1 %v2323_v6 }
 0x120   : > { %3101 = vst [vmem:[#allocation45_spill] sm:$0xff] %v2299_v58  ;;  %v2333_v58 = vld [vmem:[#allocation5 + $0x190] sm:$0xff]  ;;  %834 = vmatpush.msrb.mxu2 %v2327_v5  ;;  %854 = vmatpush.msrb.mxu3 %v2329_v63 }
 0x121   : > { %3102 = vst [vmem:[#allocation46_spill] sm:$0xff] %v2303_v7  ;;  %v2335_v7 = vld [vmem:[#allocation5 + $0x490] sm:$0xff]  ;;  %795 = vmatpush.msrb.mxu0 %v2333_v58 }
 0x122   : > { %3103 = vst [vmem:[#allocation47_spill] sm:$0xff] %v2305_v60  ;;  %v2339_v60 = vld [vmem:[#allocation5 + $0x198] sm:$0xff]  ;;  %815 = vmatpush.msrb.mxu1 %v2335_v7 }
 0x123   : > { %3104 = vst [vmem:[#allocation48_spill] sm:$0xff] %v2309_v59  ;;  %v2341_v59 = vld [vmem:[#allocation5 + $0x498] sm:$0xff]  ;;  %835 = vmatpush.msrb.mxu2 %v2339_v60 }
 0x124   : > { %3105 = vst [vmem:[#allocation49_spill] sm:$0xff] %v2311_v61  ;;  %v2345_v61 = vld [vmem:[#allocation5 + $0x160] sm:$0xff]  ;;  %855 = vmatpush.msrb.mxu3 %v2341_v59 }
 0x125   : > { %3106 = vst [vmem:[#allocation50_spill] sm:$0xff] %v2315_v57  ;;  %v2347_v57 = vld [vmem:[#allocation5 + $0x460] sm:$0xff]  ;;  %796 = vmatpush.msrb.mxu0 %v2345_v61 }
 0x126   : > { %3107 = vst [vmem:[#allocation51_spill] sm:$0xff] %v2317_v4  ;;  %v2351_v4 = vld [vmem:[#allocation5 + $0x168] sm:$0xff]  ;;  %816 = vmatpush.msrb.mxu1 %v2347_v57 }
 0x127   : > { %3108 = vst [vmem:[#allocation52_spill] sm:$0xff] %v2321_v62  ;;  %v2353_v62 = vld [vmem:[#allocation5 + $0x468] sm:$0xff]  ;;  %836 = vmatpush.msrb.mxu2 %v2351_v4 }
 0x128   : > { %3109 = vst [vmem:[#allocation53_spill] sm:$0xff] %v2323_v6  ;;  %v2357_v6 = vld [vmem:[#allocation5 + $0x130] sm:$0xff]  ;;  %856 = vmatpush.msrb.mxu3 %v2353_v62 }
 0x129   : > { %3110 = vst [vmem:[#allocation54_spill] sm:$0xff] %v2327_v5  ;;  %v2359_v5 = vld [vmem:[#allocation5 + $0x430] sm:$0xff]  ;;  %797 = vmatpush.msrb.mxu0 %v2357_v6 }
 0x12a   : > { %3111 = vst [vmem:[#allocation55_spill] sm:$0xff] %v2329_v63  ;;  %v2363_v63 = vld [vmem:[#allocation5 + $0x138] sm:$0xff]  ;;  %817 = vmatpush.msrb.mxu1 %v2359_v5 }
 0x12b   : > { %3112 = vst [vmem:[#allocation56_spill] sm:$0xff] %v2333_v58  ;;  %v2365_v58 = vld [vmem:[#allocation5 + $0x438] sm:$0xff]  ;;  %837 = vmatpush.msrb.mxu2 %v2363_v63 }
 0x12c   : > { %3113 = vst [vmem:[#allocation57_spill] sm:$0xff] %v2335_v7  ;;  %v2369_v7 = vld [vmem:[#allocation5 + $0x100] sm:$0xff]  ;;  %857 = vmatpush.msrb.mxu3 %v2365_v58 }
 0x12d   : > { %3114 = vst [vmem:[#allocation58_spill] sm:$0xff] %v2339_v60  ;;  %v2371_v60 = vld [vmem:[#allocation5 + $0x400] sm:$0xff]  ;;  %798 = vmatpush.msrb.mxu0 %v2369_v7 }
 0x12e   : > { %3115 = vst [vmem:[#allocation59_spill] sm:$0xff] %v2341_v59  ;;  %v2375_v59 = vld [vmem:[#allocation5 + $0x108] sm:$0xff]  ;;  %818 = vmatpush.msrb.mxu1 %v2371_v60 }
 0x12f   : > { %3116 = vst [vmem:[#allocation60_spill] sm:$0xff] %v2345_v61  ;;  %v2377_v61 = vld [vmem:[#allocation5 + $0x408] sm:$0xff]  ;;  %838 = vmatpush.msrb.mxu2 %v2375_v59 }
 0x130   : > { %3117 = vst [vmem:[#allocation61_spill] sm:$0xff] %v2347_v57  ;;  %v2381_v57 = vld [vmem:[#allocation5 + $0xd0] sm:$0xff]  ;;  %858 = vmatpush.msrb.mxu3 %v2377_v61 }
 0x131   : > { %3118 = vst [vmem:[#allocation62_spill] sm:$0xff] %v2351_v4  ;;  %v2383_v4 = vld [vmem:[#allocation5 + $0x3d0] sm:$0xff]  ;;  %799 = vmatpush.msrb.mxu0 %v2381_v57 }
 0x132   : > { %3119 = vst [vmem:[#allocation63_spill] sm:$0xff] %v2353_v62  ;;  %v2387_v62 = vld [vmem:[#allocation5 + $0xd8] sm:$0xff]  ;;  %819 = vmatpush.msrb.mxu1 %v2383_v4 }
 0x133   : > { %3120 = vst [vmem:[#allocation64_spill] sm:$0xff] %v2357_v6  ;;  %v2389_v6 = vld [vmem:[#allocation5 + $0x3d8] sm:$0xff]  ;;  %839 = vmatpush.msrb.mxu2 %v2387_v62 }
 0x134   : > { %3121 = vst [vmem:[#allocation65_spill] sm:$0xff] %v2359_v5  ;;  %v2391_v5 = vld [vmem:[#allocation5 + $0xa0] sm:$0xff]  ;;  %859 = vmatpush.msrb.mxu3 %v2389_v6 }
 0x135   : > { %3122 = vst [vmem:[#allocation66_spill] sm:$0xff] %v2363_v63  ;;  %v2395_v63 = vld [vmem:[#allocation5 + $0x3a0] sm:$0xff]  ;;  %800 = vmatpush.msrb.mxu0 %v2391_v5 }
 0x136   : > { %3123 = vst [vmem:[#allocation67_spill] sm:$0xff] %v2365_v58  ;;  %v2399_v58 = vld [vmem:[#allocation5 + $0xa8] sm:$0xff]  ;;  %820 = vmatpush.msrb.mxu1 %v2395_v63 }
 0x137   : > { %3124 = vst [vmem:[#allocation68_spill] sm:$0xff] %v2369_v7  ;;  %v2401_v7 = vld [vmem:[#allocation5 + $0x3a8] sm:$0xff]  ;;  %840 = vmatpush.msrb.mxu2 %v2399_v58 }
 0x138   : > { %3125 = vst [vmem:[#allocation69_spill] sm:$0xff] %v2371_v60  ;;  %v2405_v60 = vld [vmem:[#allocation5 + $0x70] sm:$0xff]  ;;  %860 = vmatpush.msrb.mxu3 %v2401_v7  ;;  %821 = vmatpush.msrb.mxu1 %v2407_v55 }
 0x139   : > { %3126 = vst [vmem:[#allocation70_spill] sm:$0xff] %v2377_v61  ;;  %v2411_v61 = vld [vmem:[#allocation5 + $0x78] sm:$0xff]  ;;  %801 = vmatpush.msrb.mxu0 %v2405_v60 }
 0x13a   : > { %3127 = vst [vmem:[#allocation71_spill] sm:$0xff] %v2381_v57  ;;  %v2413_v57 = vld [vmem:[#allocation5 + $0x378] sm:$0xff]  ;;  %841 = vmatpush.msrb.mxu2 %v2411_v61 }
 0x13b   : > { %3128 = vst [vmem:[#allocation72_spill] sm:$0xff] %v2383_v4  ;;  %v2417_v4 = vld [vmem:[#allocation5 + $0x40] sm:$0xff]  ;;  %861 = vmatpush.msrb.mxu3 %v2413_v57 }
 0x13c   : > { %3129 = vst [vmem:[#allocation73_spill] sm:$0xff] %v2387_v62  ;;  %v2419_v62 = vld [vmem:[#allocation5 + $0x340] sm:$0xff]  ;;  %802 = vmatpush.msrb.mxu0 %v2417_v4 }
 0x13d   : > { %3130 = vst [vmem:[#allocation74_spill] sm:$0xff] %v2389_v6  ;;  %v2423_v6 = vld [vmem:[#allocation5 + $0x48] sm:$0xff]  ;;  %822 = vmatpush.msrb.mxu1 %v2419_v62 }
 0x13e   : > { %3131 = vst [vmem:[#allocation75_spill] sm:$0xff] %v2391_v5  ;;  %v2425_v5 = vld [vmem:[#allocation5 + $0x348] sm:$0xff]  ;;  %842 = vmatpush.msrb.mxu2 %v2423_v6 }
 0x13f   : > { %3132 = vst [vmem:[#allocation76_spill] sm:$0xff] %v2395_v63  ;;  %v2429_v63 = vld [vmem:[#allocation5 + $0x10] sm:$0xff]  ;;  %862 = vmatpush.msrb.mxu3 %v2425_v5 }
 0x140   : > { %3133 = vst [vmem:[#allocation77_spill] sm:$0xff] %v2399_v58  ;;  %v2431_v58 = vld [vmem:[#allocation5 + $0x310] sm:$0xff]  ;;  %803 = vmatpush.msrb.mxu0 %v2429_v63 }
 0x141   : > { %3134 = vst [vmem:[#allocation78_spill] sm:$0xff] %v2401_v7  ;;  %v2435_v7 = vld [vmem:[#allocation5 + $0x18] sm:$0xff]  ;;  %823 = vmatpush.msrb.mxu1 %v2431_v58  ;;  %804 = vmatmul.f32.vlgmr.msrb.gmra.mxu0 %v1780_v9 }
 0x142   : > { %3135 = vst [vmem:[#allocation79_spill] sm:$0xff] %v2405_v60  ;;  %v2437_v60 = vld [vmem:[#allocation5 + $0x318] sm:$0xff]  ;;  %843 = vmatpush.msrb.mxu2 %v2435_v7  ;;  %824 = vmatmul.f32.vlgmr.msrb.gmra.mxu1 %v1776_v8 }
 0x143   : > { %3136 = vst [vmem:[#allocation80_spill] sm:$0xff] %v2407_v55  ;;  %v2445_v55 = vld [vmem:[#allocation5 + $0x5f0] sm:$0xff]  ;;  %863 = vmatpush.msrb.mxu3 %v2437_v60  ;;  %844 = vmatmul.f32.vlgmr.msrb.gmra.mxu2 %v1780_v9 }
 0x144   : > { %3137 = vst [vmem:[#allocation81_spill] sm:$0xff] %v2411_v61  ;;  %888 = vmatpush.msra.mxu1 %v2445_v55  ;;  %864 = vmatmul.f32.vlgmr.msrb.gmra.mxu3 %v1776_v8  ;;  %v2499_v61 = vld [vmem:[#allocation5 + $0x238] sm:$0xff] }
 0x145   : > { %3138 = vst [vmem:[#allocation82_spill] sm:$0xff] %v2413_v57  ;;  %v2443_v57 = vld [vmem:[#allocation5 + $0x2f0] sm:$0xff] }
 0x146   : > { %3139 = vst [vmem:[#allocation83_spill] sm:$0xff] %v2417_v4  ;;  %v2451_v4 = vld [vmem:[#allocation5 + $0x5f8] sm:$0xff]  ;;  %868 = vmatpush.msra.mxu0 %v2443_v57 }
 0x147   : > { %3140 = vst [vmem:[#allocation84_spill] sm:$0xff] %v2419_v62  ;;  %v2449_v62 = vld [vmem:[#allocation5 + $0x2f8] sm:$0xff]  ;;  %928 = vmatpush.msra.mxu3 %v2451_v4 }
 0x148   : > { %3141 = vst [vmem:[#allocation85_spill] sm:$0xff] %v2423_v6  ;;  %908 = vmatpush.msra.mxu2 %v2449_v62  ;;  %v2471_v6 = vld [vmem:[#allocation5 + $0x590] sm:$0xff] }
 0x149   : > { %3142 = vst [vmem:[#allocation86_spill] sm:$0xff] %v2425_v5  ;;  %v2455_v5 = vld [vmem:[#allocation5 + $0x2c0] sm:$0xff] }
 0x14a   : > { %3143 = vst [vmem:[#allocation87_spill] sm:$0xff] %v2429_v63  ;;  %v2457_v63 = vld [vmem:[#allocation5 + $0x5c0] sm:$0xff]  ;;  %869 = vmatpush.msra.mxu0 %v2455_v5 }
 0x14b   : > { %3144 = vst [vmem:[#allocation88_spill] sm:$0xff] %v2431_v58  ;;  %v2461_v58 = vld [vmem:[#allocation5 + $0x2c8] sm:$0xff]  ;;  %889 = vmatpush.msra.mxu1 %v2457_v63 }
 0x14c   : > { %3145 = vst [vmem:[#allocation89_spill] sm:$0xff] %v2435_v7  ;;  %v2463_v7 = vld [vmem:[#allocation5 + $0x5c8] sm:$0xff]  ;;  %909 = vmatpush.msra.mxu2 %v2461_v58 }
 0x14d   : > { %3146 = vst [vmem:[#allocation90_spill] sm:$0xff] %v2437_v60  ;;  %v2469_v60 = vld [vmem:[#allocation5 + $0x290] sm:$0xff]  ;;  %929 = vmatpush.msra.mxu3 %v2463_v7  ;;  %890 = vmatpush.msra.mxu1 %v2471_v6 }
 0x14e   : > { %3147 = vst [vmem:[#allocation91_spill] sm:$0xff] %v2443_v57  ;;  %v2477_v57 = vld [vmem:[#allocation5 + $0x598] sm:$0xff]  ;;  %870 = vmatpush.msra.mxu0 %v2469_v60 }
 0x14f   : > { %3148 = vst [vmem:[#allocation92_spill] sm:$0xff] %v2445_v55  ;;  %v2475_v55 = vld [vmem:[#allocation5 + $0x298] sm:$0xff]  ;;  %930 = vmatpush.msra.mxu3 %v2477_v57 }
 0x150   : > { %3149 = vst [vmem:[#allocation93_spill] sm:$0xff] %v2449_v62  ;;  %910 = vmatpush.msra.mxu2 %v2475_v55  ;;  %v2495_v62 = vld [vmem:[#allocation5 + $0x530] sm:$0xff] }
 0x151   : > { %3150 = vst [vmem:[#allocation94_spill] sm:$0xff] %v2451_v4  ;;  %v2481_v4 = vld [vmem:[#allocation5 + $0x260] sm:$0xff] }
 0x152   : > { %3151 = vst [vmem:[#allocation95_spill] sm:$0xff] %v2455_v5  ;;  %v2483_v5 = vld [vmem:[#allocation5 + $0x560] sm:$0xff]  ;;  %871 = vmatpush.msra.mxu0 %v2481_v4 }
 0x153   : > { %3152 = vst [vmem:[#allocation96_spill] sm:$0xff] %v2457_v63  ;;  %v2487_v63 = vld [vmem:[#allocation5 + $0x268] sm:$0xff]  ;;  %891 = vmatpush.msra.mxu1 %v2483_v5 }
 0x154   : > { %3153 = vst [vmem:[#allocation97_spill] sm:$0xff] %v2461_v58  ;;  %v2489_v58 = vld [vmem:[#allocation5 + $0x568] sm:$0xff]  ;;  %911 = vmatpush.msra.mxu2 %v2487_v63 }
 0x155   : > { %3154 = vst [vmem:[#allocation98_spill] sm:$0xff] %v2463_v7  ;;  %v2493_v7 = vld [vmem:[#allocation5 + $0x230] sm:$0xff]  ;;  %931 = vmatpush.msra.mxu3 %v2489_v58  ;;  %892 = vmatpush.msra.mxu1 %v2495_v62 }
 0x156   : > { %3155 = vst [vmem:[#allocation99_spill] sm:$0xff] %v2469_v60  ;;  %v2501_v60 = vld [vmem:[#allocation5 + $0x538] sm:$0xff]  ;;  %872 = vmatpush.msra.mxu0 %v2493_v7  ;;  %912 = vmatpush.msra.mxu2 %v2499_v61 }
 0x157   : > { %3156 = vst [vmem:[#allocation100_spill] sm:$0xff] %v2471_v6  ;;  %v2505_v6 = vld [vmem:[#allocation5 + $0x200] sm:$0xff]  ;;  %932 = vmatpush.msra.mxu3 %v2501_v60 }
 0x158   : > { %3157 = vst [vmem:[#allocation101_spill] sm:$0xff] %v2475_v55  ;;  %v2507_v55 = vld [vmem:[#allocation5 + $0x500] sm:$0xff]  ;;  %873 = vmatpush.msra.mxu0 %v2505_v6 }
 0x159   : > { %3158 = vst [vmem:[#allocation102_spill] sm:$0xff] %v2477_v57  ;;  %v2511_v57 = vld [vmem:[#allocation5 + $0x208] sm:$0xff]  ;;  %893 = vmatpush.msra.mxu1 %v2507_v55 }
 0x15a   : > { %3159 = vst [vmem:[#allocation103_spill] sm:$0xff] %v2481_v4  ;;  %v2513_v4 = vld [vmem:[#allocation5 + $0x508] sm:$0xff]  ;;  %913 = vmatpush.msra.mxu2 %v2511_v57 }
 0x15b   : > { %3160 = vst [vmem:[#allocation104_spill] sm:$0xff] %v2483_v5  ;;  %v2517_v5 = vld [vmem:[#allocation5 + $0x1d0] sm:$0xff]  ;;  %933 = vmatpush.msra.mxu3 %v2513_v4 }
 0x15c   : > { %3161 = vst [vmem:[#allocation105_spill] sm:$0xff] %v2487_v63  ;;  %v2519_v63 = vld [vmem:[#allocation5 + $0x4d0] sm:$0xff]  ;;  %874 = vmatpush.msra.mxu0 %v2517_v5 }
 0x15d   : > { %3162 = vst [vmem:[#allocation106_spill] sm:$0xff] %v2489_v58  ;;  %v2523_v58 = vld [vmem:[#allocation5 + $0x1d8] sm:$0xff]  ;;  %894 = vmatpush.msra.mxu1 %v2519_v63 }
 0x15e   : > { %3163 = vst [vmem:[#allocation107_spill] sm:$0xff] %v2493_v7  ;;  %v2525_v7 = vld [vmem:[#allocation5 + $0x4d8] sm:$0xff]  ;;  %914 = vmatpush.msra.mxu2 %v2523_v58 }
 0x15f   : > { %3164 = vst [vmem:[#allocation108_spill] sm:$0xff] %v2495_v62  ;;  %v2529_v62 = vld [vmem:[#allocation5 + $0x1a0] sm:$0xff]  ;;  %934 = vmatpush.msra.mxu3 %v2525_v7 }
 0x160   : > { %3165 = vst [vmem:[#allocation109_spill] sm:$0xff] %v2499_v61  ;;  %v2531_v61 = vld [vmem:[#allocation5 + $0x4a0] sm:$0xff]  ;;  %875 = vmatpush.msra.mxu0 %v2529_v62 }
 0x161   : > { %3166 = vst [vmem:[#allocation110_spill] sm:$0xff] %v2501_v60  ;;  %v2535_v60 = vld [vmem:[#allocation5 + $0x1a8] sm:$0xff]  ;;  %895 = vmatpush.msra.mxu1 %v2531_v61 }
 0x162   : > { %3167 = vst [vmem:[#allocation111_spill] sm:$0xff] %v2505_v6  ;;  %v2537_v6 = vld [vmem:[#allocation5 + $0x4a8] sm:$0xff]  ;;  %915 = vmatpush.msra.mxu2 %v2535_v60 }
 0x163   : > { %3168 = vst [vmem:[#allocation112_spill] sm:$0xff] %v2507_v55  ;;  %v2541_v55 = vld [vmem:[#allocation5 + $0x170] sm:$0xff]  ;;  %935 = vmatpush.msra.mxu3 %v2537_v6 }
 0x164   : > { %3169 = vst [vmem:[#allocation113_spill] sm:$0xff] %v2511_v57  ;;  %v2543_v57 = vld [vmem:[#allocation5 + $0x470] sm:$0xff]  ;;  %876 = vmatpush.msra.mxu0 %v2541_v55 }
 0x165   : > { %3170 = vst [vmem:[#allocation114_spill] sm:$0xff] %v2513_v4  ;;  %v2547_v4 = vld [vmem:[#allocation5 + $0x178] sm:$0xff]  ;;  %896 = vmatpush.msra.mxu1 %v2543_v57 }
 0x166   : > { %3171 = vst [vmem:[#allocation115_spill] sm:$0xff] %v2517_v5  ;;  %v2549_v5 = vld [vmem:[#allocation5 + $0x478] sm:$0xff]  ;;  %916 = vmatpush.msra.mxu2 %v2547_v4 }
 0x167   : > { %3172 = vst [vmem:[#allocation116_spill] sm:$0xff] %v2519_v63  ;;  %v2553_v63 = vld [vmem:[#allocation5 + $0x140] sm:$0xff]  ;;  %936 = vmatpush.msra.mxu3 %v2549_v5 }
 0x168   : > { %3173 = vst [vmem:[#allocation117_spill] sm:$0xff] %v2523_v58  ;;  %v2555_v58 = vld [vmem:[#allocation5 + $0x440] sm:$0xff]  ;;  %877 = vmatpush.msra.mxu0 %v2553_v63 }
 0x169   : > { %3174 = vst [vmem:[#allocation118_spill] sm:$0xff] %v2525_v7  ;;  %v2559_v7 = vld [vmem:[#allocation5 + $0x148] sm:$0xff]  ;;  %897 = vmatpush.msra.mxu1 %v2555_v58 }
 0x16a   : > { %3175 = vst [vmem:[#allocation119_spill] sm:$0xff] %v2529_v62  ;;  %v2561_v62 = vld [vmem:[#allocation5 + $0x448] sm:$0xff]  ;;  %917 = vmatpush.msra.mxu2 %v2559_v7 }
 0x16b   : > { %3176 = vst [vmem:[#allocation120_spill] sm:$0xff] %v2531_v61  ;;  %v2565_v61 = vld [vmem:[#allocation5 + $0x110] sm:$0xff]  ;;  %937 = vmatpush.msra.mxu3 %v2561_v62 }
 0x16c   : > { %3177 = vst [vmem:[#allocation121_spill] sm:$0xff] %v2535_v60  ;;  %v2567_v60 = vld [vmem:[#allocation5 + $0x410] sm:$0xff]  ;;  %878 = vmatpush.msra.mxu0 %v2565_v61 }
 0x16d   : > { %3178 = vst [vmem:[#allocation122_spill] sm:$0xff] %v2537_v6  ;;  %v2571_v6 = vld [vmem:[#allocation5 + $0x118] sm:$0xff]  ;;  %898 = vmatpush.msra.mxu1 %v2567_v60 }
 0x16e   : > { %3179 = vst [vmem:[#allocation123_spill] sm:$0xff] %v2541_v55  ;;  %v2573_v55 = vld [vmem:[#allocation5 + $0x418] sm:$0xff]  ;;  %918 = vmatpush.msra.mxu2 %v2571_v6 }
 0x16f   : > { %3180 = vst [vmem:[#allocation124_spill] sm:$0xff] %v2543_v57  ;;  %v2577_v57 = vld [vmem:[#allocation5 + $0xe0] sm:$0xff]  ;;  %938 = vmatpush.msra.mxu3 %v2573_v55 }
 0x170   : > { %3181 = vst [vmem:[#allocation125_spill] sm:$0xff] %v2547_v4  ;;  %v2579_v4 = vld [vmem:[#allocation5 + $0x3e0] sm:$0xff]  ;;  %879 = vmatpush.msra.mxu0 %v2577_v57 }
 0x171   : > { %3182 = vst [vmem:[#allocation126_spill] sm:$0xff] %v2549_v5  ;;  %v2583_v5 = vld [vmem:[#allocation5 + $0xe8] sm:$0xff]  ;;  %899 = vmatpush.msra.mxu1 %v2579_v4 }
 0x172   : > { %3183 = vst [vmem:[#allocation127_spill] sm:$0xff] %v2553_v63  ;;  %v2585_v63 = vld [vmem:[#allocation5 + $0x3e8] sm:$0xff]  ;;  %919 = vmatpush.msra.mxu2 %v2583_v5 }
 0x173   : > { %3184 = vst [vmem:[#allocation128_spill] sm:$0xff] %v2555_v58  ;;  %v2589_v58 = vld [vmem:[#allocation5 + $0xb0] sm:$0xff]  ;;  %939 = vmatpush.msra.mxu3 %v2585_v63 }
 0x174   : > { %3185 = vst [vmem:[#allocation129_spill] sm:$0xff] %v2559_v7  ;;  %v2591_v7 = vld [vmem:[#allocation5 + $0x3b0] sm:$0xff]  ;;  %880 = vmatpush.msra.mxu0 %v2589_v58 }
 0x175   : > { %3186 = vst [vmem:[#allocation130_spill] sm:$0xff] %v2561_v62  ;;  %v2595_v62 = vld [vmem:[#allocation5 + $0xb8] sm:$0xff]  ;;  %900 = vmatpush.msra.mxu1 %v2591_v7 }
 0x176   : > { %3187 = vst [vmem:[#allocation131_spill] sm:$0xff] %v2565_v61  ;;  %v2597_v61 = vld [vmem:[#allocation5 + $0x3b8] sm:$0xff]  ;;  %920 = vmatpush.msra.mxu2 %v2595_v62 }
 0x177   : > { %3188 = vst [vmem:[#allocation132_spill] sm:$0xff] %v2567_v60  ;;  %v2601_v60 = vld [vmem:[#allocation5 + $0x80] sm:$0xff]  ;;  %940 = vmatpush.msra.mxu3 %v2597_v61 }
 0x178   : > { %3189 = vst [vmem:[#allocation133_spill] sm:$0xff] %v2571_v6  ;;  %v2603_v6 = vld [vmem:[#allocation5 + $0x380] sm:$0xff]  ;;  %881 = vmatpush.msra.mxu0 %v2601_v60 }
 0x179   : > { %3190 = vst [vmem:[#allocation134_spill] sm:$0xff] %v2573_v55  ;;  %v2607_v55 = vld [vmem:[#allocation5 + $0x88] sm:$0xff]  ;;  %901 = vmatpush.msra.mxu1 %v2603_v6 }
 0x17a   : > { %3191 = vst [vmem:[#allocation135_spill] sm:$0xff] %v2577_v57  ;;  %v2609_v57 = vld [vmem:[#allocation5 + $0x388] sm:$0xff]  ;;  %921 = vmatpush.msra.mxu2 %v2607_v55 }
 0x17b   : > { %3192 = vst [vmem:[#allocation136_spill] sm:$0xff] %v2579_v4  ;;  %v2613_v4 = vld [vmem:[#allocation5 + $0x50] sm:$0xff]  ;;  %941 = vmatpush.msra.mxu3 %v2609_v57 }
 0x17c   : > { %3193 = vst [vmem:[#allocation137_spill] sm:$0xff] %v2583_v5  ;;  %v2615_v5 = vld [vmem:[#allocation5 + $0x350] sm:$0xff]  ;;  %882 = vmatpush.msra.mxu0 %v2613_v4 }
 0x17d   : > { %3194 = vst [vmem:[#allocation138_spill] sm:$0xff] %v2585_v63  ;;  %v2619_v63 = vld [vmem:[#allocation5 + $0x58] sm:$0xff]  ;;  %902 = vmatpush.msra.mxu1 %v2615_v5 }
 0x17e   : > { %3195 = vst [vmem:[#allocation139_spill] sm:$0xff] %v2589_v58  ;;  %v2621_v58 = vld [vmem:[#allocation5 + $0x358] sm:$0xff]  ;;  %922 = vmatpush.msra.mxu2 %v2619_v63 }
 0x17f   : > { %3196 = vst [vmem:[#allocation140_spill] sm:$0xff] %v2591_v7  ;;  %v2625_v7 = vld [vmem:[#allocation5 + $0x20] sm:$0xff]  ;;  %942 = vmatpush.msra.mxu3 %v2621_v58 }
 0x180   : > { %3197 = vst [vmem:[#allocation141_spill] sm:$0xff] %v2595_v62  ;;  %v2627_v62 = vld [vmem:[#allocation5 + $0x320] sm:$0xff]  ;;  %883 = vmatpush.msra.mxu0 %v2625_v7 }
 0x181   : > { %3198 = vst [vmem:[#allocation142_spill] sm:$0xff] %v2597_v61  ;;  %v2631_v61 = vld [vmem:[#allocation5 + $0x28] sm:$0xff]  ;;  %903 = vmatpush.msra.mxu1 %v2627_v62  ;;  %884 = vmatmul.f32.vlgmr.msra.gmra.mxu0 %v1780_v9 }
 0x182   : > { %3199 = vst [vmem:[#allocation143_spill] sm:$0xff] %v2601_v60  ;;  %v2633_v60 = vld [vmem:[#allocation5 + $0x328] sm:$0xff]  ;;  %923 = vmatpush.msra.mxu2 %v2631_v61  ;;  %904 = vmatmul.f32.vlgmr.msra.gmra.mxu1 %v1776_v8 }
 0x183   : > { %943 = vmatpush.msra.mxu3 %v2633_v60  ;;  %924 = vmatmul.f32.vlgmr.msra.gmra.mxu2 %v1780_v9 }
 0x184   : > { %944 = vmatmul.f32.vlgmr.msra.gmra.mxu3 %v1776_v8  ;;  %1072 = vmatpush.msrb.mxu0 %v2057_v0  ;;  %v3200_v0 = vld [vmem:[#allocation14_spill] sm:$0xff] }
 0x185   : > { %1112 = vmatpush.msrb.mxu2 %v2061_v2  ;;  %1092 = vmatpush.msrb.mxu1 %v2059_v1  ;;  %v3201_v1 = vld [vmem:[#allocation15_spill] sm:$0xff]  ;;  %v3202_v2 = vld [vmem:[#allocation16_spill] sm:$0xff] }
 0x186   : > { %1132 = vmatpush.msrb.mxu3 %v2065_v3  ;;  %1073 = vmatpush.msrb.mxu0 %v2067_v10  ;;  %v3203_v3 = vld [vmem:[#allocation18_spill] sm:$0xff]  ;;  %v3204_v10 = vld [vmem:[#allocation17_spill] sm:$0xff] }
 0x187   : > { %1113 = vmatpush.msrb.mxu2 %v2073_v12  ;;  %1093 = vmatpush.msrb.mxu1 %v2069_v11  ;;  %v3205_v11 = vld [vmem:[#allocation19_spill] sm:$0xff]  ;;  %v3206_v12 = vld [vmem:[#allocation20_spill] sm:$0xff] }
 0x188   : > { %1133 = vmatpush.msrb.mxu3 %v2075_v13  ;;  %1074 = vmatpush.msrb.mxu0 %v2077_v14  ;;  %v3207_v13 = vld [vmem:[#allocation22_spill] sm:$0xff]  ;;  %v3208_v14 = vld [vmem:[#allocation21_spill] sm:$0xff] }
 0x189   : > { %1114 = vmatpush.msrb.mxu2 %v2083_v16  ;;  %1094 = vmatpush.msrb.mxu1 %v2081_v15  ;;  %v3209_v15 = vld [vmem:[#allocation23_spill] sm:$0xff]  ;;  %v3210_v16 = vld [vmem:[#allocation24_spill] sm:$0xff] }
 0x18a   : > { %1134 = vmatpush.msrb.mxu3 %v2085_v17  ;;  %1075 = vmatpush.msrb.mxu0 %v2089_v18  ;;  %v3211_v17 = vld [vmem:[#allocation26_spill] sm:$0xff]  ;;  %v3212_v18 = vld [vmem:[#allocation28_spill] sm:$0xff] }
 0x18b   : > { %1115 = vmatpush.msrb.mxu2 %v2095_v20  ;;  %1095 = vmatpush.msrb.mxu1 %v2091_v19  ;;  %v3213_v19 = vld [vmem:[#allocation30_spill] sm:$0xff]  ;;  %v3214_v20 = vld [vmem:[#allocation25_spill] sm:$0xff] }
 0x18c   : > { %1135 = vmatpush.msrb.mxu3 %v2097_v21  ;;  %1076 = vmatpush.msrb.mxu0 %v2101_v22  ;;  %v3215_v21 = vld [vmem:[#allocation27_spill] sm:$0xff]  ;;  %v3216_v22 = vld [vmem:[#allocation32_spill] sm:$0xff] }
 0x18d   : > { %1116 = vmatpush.msrb.mxu2 %v2107_v24  ;;  %1096 = vmatpush.msrb.mxu1 %v2103_v23  ;;  %v3217_v23 = vld [vmem:[#allocation34_spill] sm:$0xff]  ;;  %v3218_v24 = vld [vmem:[#allocation29_spill] sm:$0xff] }
 0x18e   : > { %1136 = vmatpush.msrb.mxu3 %v2109_v25  ;;  %1077 = vmatpush.msrb.mxu0 %v2113_v26  ;;  %v3219_v25 = vld [vmem:[#allocation31_spill] sm:$0xff]  ;;  %v3220_v26 = vld [vmem:[#allocation36_spill] sm:$0xff] }
 0x18f   : > { %1117 = vmatpush.msrb.mxu2 %v2119_v28  ;;  %1097 = vmatpush.msrb.mxu1 %v2115_v27  ;;  %v3221_v27 = vld [vmem:[#allocation38_spill] sm:$0xff]  ;;  %v3222_v28 = vld [vmem:[#allocation33_spill] sm:$0xff] }
 0x190   : > { %1137 = vmatpush.msrb.mxu3 %v2121_v29  ;;  %1078 = vmatpush.msrb.mxu0 %v2125_v30  ;;  %v3223_v29 = vld [vmem:[#allocation35_spill] sm:$0xff]  ;;  %v3224_v30 = vld [vmem:[#allocation40_spill] sm:$0xff] }
 0x191   : > { %1118 = vmatpush.msrb.mxu2 %v2131_v32  ;;  %1098 = vmatpush.msrb.mxu1 %v2127_v31  ;;  %v3225_v31 = vld [vmem:[#allocation42_spill] sm:$0xff]  ;;  %v3226_v32 = vld [vmem:[#allocation37_spill] sm:$0xff] }
 0x192   : > { %1138 = vmatpush.msrb.mxu3 %v2133_v33  ;;  %1079 = vmatpush.msrb.mxu0 %v2137_v34  ;;  %v3227_v33 = vld [vmem:[#allocation39_spill] sm:$0xff]  ;;  %v3228_v34 = vld [vmem:[#allocation44_spill] sm:$0xff] }
 0x193   : > { %1119 = vmatpush.msrb.mxu2 %v2143_v36  ;;  %1099 = vmatpush.msrb.mxu1 %v2139_v35  ;;  %v3229_v35 = vld [vmem:[#allocation46_spill] sm:$0xff]  ;;  %v3230_v36 = vld [vmem:[#allocation41_spill] sm:$0xff] }
 0x194   : > { %1139 = vmatpush.msrb.mxu3 %v2145_v37  ;;  %1080 = vmatpush.msrb.mxu0 %v2149_v38  ;;  %v3231_v37 = vld [vmem:[#allocation43_spill] sm:$0xff]  ;;  %v3232_v38 = vld [vmem:[#allocation48_spill] sm:$0xff] }
 0x195   : > { %1120 = vmatpush.msrb.mxu2 %v2155_v40  ;;  %1100 = vmatpush.msrb.mxu1 %v2151_v39  ;;  %v3233_v39 = vld [vmem:[#allocation50_spill] sm:$0xff]  ;;  %v3234_v40 = vld [vmem:[#allocation45_spill] sm:$0xff] }
 0x196   : > { %1140 = vmatpush.msrb.mxu3 %v2157_v41  ;;  %1081 = vmatpush.msrb.mxu0 %v2161_v42  ;;  %v3235_v41 = vld [vmem:[#allocation47_spill] sm:$0xff]  ;;  %v3236_v42 = vld [vmem:[#allocation52_spill] sm:$0xff] }
 0x197   : > { %1121 = vmatpush.msrb.mxu2 %v2167_v44  ;;  %1101 = vmatpush.msrb.mxu1 %v2163_v43  ;;  %v3237_v43 = vld [vmem:[#allocation54_spill] sm:$0xff]  ;;  %v3238_v44 = vld [vmem:[#allocation49_spill] sm:$0xff] }
 0x198   : > { %1141 = vmatpush.msrb.mxu3 %v2169_v45  ;;  %1082 = vmatpush.msrb.mxu0 %v2173_v46  ;;  %v3239_v45 = vld [vmem:[#allocation51_spill] sm:$0xff]  ;;  %v3240_v46 = vld [vmem:[#allocation56_spill] sm:$0xff] }
 0x199   : > { %1122 = vmatpush.msrb.mxu2 %v2179_v48  ;;  %1102 = vmatpush.msrb.mxu1 %v2175_v47  ;;  %v3241_v47 = vld [vmem:[#allocation58_spill] sm:$0xff]  ;;  %v3242_v48 = vld [vmem:[#allocation53_spill] sm:$0xff] }
 0x19a   : > { %1142 = vmatpush.msrb.mxu3 %v2181_v49  ;;  %1083 = vmatpush.msrb.mxu0 %v2185_v50  ;;  %v3243_v49 = vld [vmem:[#allocation55_spill] sm:$0xff]  ;;  %v3244_v50 = vld [vmem:[#allocation60_spill] sm:$0xff] }
 0x19b   : > { %1123 = vmatpush.msrb.mxu2 %v2191_v52  ;;  %1103 = vmatpush.msrb.mxu1 %v2187_v51  ;;  %v3245_v51 = vld [vmem:[#allocation62_spill] sm:$0xff]  ;;  %v3246_v52 = vld [vmem:[#allocation57_spill] sm:$0xff] }
 0x19c   : > { %1143 = vmatpush.msrb.mxu3 %v2193_v53  ;;  %1084 = vmatpush.msrb.mxu0 %v2197_v54  ;;  %v3247_v53 = vld [vmem:[#allocation59_spill] sm:$0xff]  ;;  %v3248_v54 = vld [vmem:[#allocation64_spill] sm:$0xff] }
 0x19d   : > { %1124 = vmatpush.msrb.mxu2 %v2203_v56  ;;  %1104 = vmatpush.msrb.mxu1 %v3200_v0  ;;  %v3249_v56 = vld [vmem:[#allocation66_spill] sm:$0xff]  ;;  %v3250_v0 = vld [vmem:[#allocation61_spill] sm:$0xff] }
 0x19e   : > { %1144 = vmatpush.msrb.mxu3 %v3201_v1  ;;  %1085 = vmatpush.msrb.mxu0 %v3202_v2  ;;  %v3251_v1 = vld [vmem:[#allocation63_spill] sm:$0xff]  ;;  %v3252_v2 = vld [vmem:[#allocation68_spill] sm:$0xff] }
 0x19f   : > { %1125 = vmatpush.msrb.mxu2 %v3203_v3  ;;  %1105 = vmatpush.msrb.mxu1 %v3204_v10  ;;  %v3253_v3 = vld [vmem:[#allocation65_spill] sm:$0xff]  ;;  %v3254_v10 = vld [vmem:[#allocation67_spill] sm:$0xff] }
 0x1a0   : > { %1145 = vmatpush.msrb.mxu3 %v3205_v11  ;;  %1086 = vmatpush.msrb.mxu0 %v3206_v12  ;;  %v3255_v11 = vld [vmem:[#allocation71_spill] sm:$0xff]  ;;  %v3256_v12 = vld [vmem:[#allocation73_spill] sm:$0xff] }
 0x1a1   : > { %1126 = vmatpush.msrb.mxu2 %v3207_v13  ;;  %1106 = vmatpush.msrb.mxu1 %v3208_v14  ;;  %v3257_v13 = vld [vmem:[#allocation69_spill] sm:$0xff]  ;;  %v3258_v14 = vld [vmem:[#allocation70_spill] sm:$0xff] }
 0x1a2   : > { %1146 = vmatpush.msrb.mxu3 %v3209_v15  ;;  %1087 = vmatpush.msrb.mxu0 %v3210_v16  ;;  %v3259_v15 = vld [vmem:[#allocation75_spill] sm:$0xff]  ;;  %v3260_v16 = vld [vmem:[#allocation77_spill] sm:$0xff] }
 0x1a3   : > { %1127 = vmatpush.msrb.mxu2 %v3211_v17  ;;  %1107 = vmatpush.msrb.mxu1 %v3214_v20  ;;  %v3261_v17 = vld [vmem:[#allocation72_spill] sm:$0xff] }
 0x1a4   : > { %1152 = vmatpush.msra.mxu0 %v3212_v18  ;;  %1147 = vmatpush.msrb.mxu3 %v3215_v21  ;;  %v3263_v18 = vld [vmem:[#allocation79_spill] sm:$0xff]  ;;  %v3265_v20 = vld [vmem:[#allocation76_spill] sm:$0xff]  ;;  %v3266_v21 = vld [vmem:[#allocation78_spill] sm:$0xff] }
 0x1a5   : > { %1192 = vmatpush.msra.mxu2 %v3213_v19  ;;  %1172 = vmatpush.msra.mxu1 %v3218_v24  ;;  %v3264_v19 = vld [vmem:[#allocation81_spill] sm:$0xff]  ;;  %v745_v24 = vpop.f32.mrf.mxu1 }
 0x1a6   : > { %1153 = vmatpush.msra.mxu0 %v3216_v22  ;;  %1212 = vmatpush.msra.mxu3 %v3219_v25  ;;  %v725_v22 = vpop.f32.mrf.mxu0  ;;  %v3267_v25 = vld [vmem:[#allocation83_spill] sm:$0xff] }
 0x1a7   : > { %1193 = vmatpush.msra.mxu2 %v3217_v23  ;;  %1173 = vmatpush.msra.mxu1 %v3222_v28  ;;  %v505_v23 = vld [vmem:[%s2766_s24] sm:$0xff]  ;;  %v3269_v28 = vld [vmem:[#allocation80_spill] sm:$0xff] }
 0x1a8   : > { %1154 = vmatpush.msra.mxu0 %v3220_v26  ;;  %1213 = vmatpush.msra.mxu3 %v3223_v29  ;;  %v3268_v26 = vld [vmem:[#allocation85_spill] sm:$0xff]  ;;  %v3270_v29 = vld [vmem:[#allocation82_spill] sm:$0xff] }
 0x1a9   : > { %1194 = vmatpush.msra.mxu2 %v3221_v27  ;;  %1174 = vmatpush.msra.mxu1 %v3226_v32  ;;  %v746_v27 = vadd.f32 %v745_v24, %v725_v22 }
 0x1aa   : > { %1155 = vmatpush.msra.mxu0 %v3224_v30  ;;  %1214 = vmatpush.msra.mxu3 %v3227_v33  ;;  %v3271_v30 = vld [vmem:[#allocation87_spill] sm:$0xff]  ;;  %v3273_v33 = vld [vmem:[#allocation84_spill] sm:$0xff] }
 0x1ab   : > { %1195 = vmatpush.msra.mxu2 %v3225_v31  ;;  %1175 = vmatpush.msra.mxu1 %v3230_v36  ;;  %v3272_v31 = vld [vmem:[#allocation89_spill] sm:$0xff]  ;;  %v948_v32 = vadd.f32 %v746_v27, %v505_v23  ;;  %v3275_v36 = vld [vmem:[#allocation88_spill] sm:$0xff] }
 0x1ac   : > { %1156 = vmatpush.msra.mxu0 %v3228_v34  ;;  %1215 = vmatpush.msra.mxu3 %v3231_v37  ;;  %v3274_v34 = vld [vmem:[#allocation86_spill] sm:$0xff] }
 0x1ad   : > { %1196 = vmatpush.msra.mxu2 %v3229_v35  ;;  %1176 = vmatpush.msra.mxu1 %v3234_v40  ;;  %v1586_v35 = vmul.f32 -1.442695, %v948_v32  ;;  %v3276_v37 = vld [vmem:[#allocation90_spill] sm:$0xff]  ;;  %v785_v40 = vpop.f32.mrf.mxu3 }
 0x1ae   : > { %1157 = vmatpush.msra.mxu0 %v3232_v38  ;;  %1216 = vmatpush.msra.mxu3 %v3235_v41  ;;  %v765_v38 = vpop.f32.mrf.mxu2 }
 0x1af   : > { %1197 = vmatpush.msra.mxu2 %v3233_v39  ;;  %1177 = vmatpush.msra.mxu1 %v3238_v44  ;;  %1643 = vpow2.f32 %v1586_v35  ;;  %v506_v39 = vld [vmem:[%s2766_s24 + $0x8] sm:$0xff]  ;;  %v786_v41 = vadd.f32 %v785_v40, %v765_v38  ;;  %v3279_v38 = vld [vmem:[#allocation95_spill] sm:$0xff] }
 0x1b0   : > { %1158 = vmatpush.msra.mxu0 %v3236_v42  ;;  %1217 = vmatpush.msra.mxu3 %v3239_v45 }
 0x1b1   : > { %1198 = vmatpush.msra.mxu2 %v3237_v43  ;;  %1178 = vmatpush.msra.mxu1 %v3242_v48  ;;  %v949_v42 = vadd.f32 %v786_v41, %v506_v39  ;;  %v3280_v39 = vld [vmem:[#allocation97_spill] sm:$0xff]  ;;  %v3281_v41 = vld [vmem:[#allocation99_spill] sm:$0xff] }
 0x1b2   : > { %1159 = vmatpush.msra.mxu0 %v3240_v46  ;;  %1218 = vmatpush.msra.mxu3 %v3243_v49 }
 0x1b3   : > { %1199 = vmatpush.msra.mxu2 %v3241_v47  ;;  %1179 = vmatpush.msra.mxu1 %v3246_v52  ;;  %v1587_v45 = vmul.f32 -1.442695, %v949_v42  ;;  %v3282_v42 = vld [vmem:[#allocation101_spill] sm:$0xff] }
 0x1b4   : > { %1160 = vmatpush.msra.mxu0 %v3244_v50  ;;  %1219 = vmatpush.msra.mxu3 %v3247_v53 }
 0x1b5   : > { %1200 = vmatpush.msra.mxu2 %v3245_v51  ;;  %1180 = vmatpush.msra.mxu1 %v3250_v0  ;;  %v1644_v43 = vpop.eup %1643  ;;  %v2786_v0 = vld [vmem:[%s2935_s7] ss:$0 sm:$0xff] }
 0x1b6   : > { %1161 = vmatpush.msra.mxu0 %v3248_v54  ;;  %1220 = vmatpush.msra.mxu3 %v3251_v1  ;;  %v956_v44 = vadd.f32 1.0, %v1644_v43  ;;  %v3283_v43 = vld [vmem:[#allocation103_spill] sm:$0xff] }
 0x1b7   : > { %1201 = vmatpush.msra.mxu2 %v3249_v56  ;;  %1181 = vmatpush.msra.mxu1 %v3253_v3 }
 0x1b8   : > { %1162 = vmatpush.msra.mxu0 %v3252_v2  ;;  %1221 = vmatpush.msra.mxu3 %v3254_v10  ;;  %1645 = vrcp.f32 %v956_v44  ;;  %v969_v50 = vand.u32 2147483648, %v956_v44  ;;  %vm963_vm1 = vweird.f32 %v956_v44  ;;  %v967_v52 = vand.u32 2147483647, %v956_v44 }
 0x1b9   : > { %1202 = vmatpush.msra.mxu2 %v2375_v59  ;;  %1182 = vmatpush.msra.mxu1 %v3257_v13  ;;  %v3262_v59 = vld [vmem:[#allocation74_spill] sm:$0xff]  ;;  %1647 = vpow2.f32 %v1587_v45  ;;  %v3285_v45 = vld [vmem:[#allocation107_spill] sm:$0xff] }
 0x1ba   : > { %1163 = vmatpush.msra.mxu0 %v3255_v11  ;;  %1222 = vmatpush.msra.mxu3 %v3258_v14  ;;  %v970_v54 = vor.u32 1.1754944e-38, %v969_v50  ;;  %vm968_vm4 = vcmp.eq.f32.partialorder %v967_v52, 8.507059e+37  ;;  %v3289_v50 = vld [vmem:[#allocation115_spill] sm:$0xff] }
 0x1bb   : > { %1203 = vmatpush.msra.mxu2 %v3256_v12  ;;  %1183 = vmatpush.msra.mxu1 %v3261_v17 }
 0x1bc   : > { %1164 = vmatpush.msra.mxu0 %v3259_v15  ;;  %1223 = vmatpush.msra.mxu3 %v3262_v59 }
 0x1bd   : > { %1204 = vmatpush.msra.mxu2 %v3260_v16  ;;  %1184 = vmatpush.msra.mxu1 %v3265_v20  ;;  %v507_v16 = vld [vmem:[%s2766_s24 + $0x10] sm:$0xff] }
 0x1be   : > { %1165 = vmatpush.msra.mxu0 %v3263_v18  ;;  %1224 = vmatpush.msra.mxu3 %v3266_v21  ;;  %v1646_v46 = vpop.eup %1645  ;;  %v805_v1 = vpop.f32.mrf.mxu0 }
 0x1bf   : > { %1205 = vmatpush.msra.mxu2 %v3264_v19  ;;  %1185 = vmatpush.msra.mxu1 %v3269_v28  ;;  %v1648_v47 = vpop.eup %1647  ;;  %v959_v48 = vmul.f32 %v1646_v46, %v956_v44  ;;  %vm964_vm2 = vweird.f32 %v1646_v46  ;;  %v825_v2 = vpop.f32.mrf.mxu1  ;;  %v3284_v44 = vld [vmem:[#allocation105_spill] sm:$0xff] }
 0x1c0   : > { %1166 = vmatpush.msra.mxu0 %v3267_v25  ;;  %1225 = vmatpush.msra.mxu3 %v3270_v29  ;;  %v957_v49 = vadd.f32 1.0, %v1648_v47  ;;  %vm965_vm3 = vmor %vm963_vm1, %vm964_vm2  ;;  %v826_v3 = vadd.f32 %v825_v2, %v805_v1  ;;  %v513_v25 = vld [vmem:[%s2790_s6] sm:$0xff]  ;;  %v3287_v47 = vld [vmem:[#allocation111_spill] sm:$0xff] }
 0x1c1   : > { %1206 = vmatpush.msra.mxu2 %v3268_v26  ;;  %1186 = vmatpush.msra.mxu1 %v3273_v33  ;;  %v960_v51 = vsub.f32 1.0, %v959_v48  ;;  %v3288_v48 = vld [vmem:[#allocation113_spill] sm:$0xff]  ;;  %v3291_v2 = vld [vmem:[#allocation119_spill] sm:$0xff] }
 0x1c2   : > { %1167 = vmatpush.msra.mxu0 %v3271_v30  ;;  %1226 = vmatpush.msra.mxu3 %v3274_v34  ;;  %1649 = vrcp.f32 %v957_v49  ;;  %v1032_v14 = vadd.f32 %v2786_v0, %v826_v3  ;;  %vm978_vm5 = vweird.f32 %v957_v49  ;;  %v984_v15 = vand.u32 2147483648, %v957_v49  ;;  %v3292_v3 = vld [vmem:[#allocation121_spill] sm:$0xff] }
 0x1c3   : > { %1207 = vmatpush.msra.mxu2 %v3272_v31  ;;  %1187 = vmatpush.msra.mxu1 %v3275_v36  ;;  %v961_v53 = vmul.f32 %v1646_v46, %v960_v51  ;;  %v982_v59 = vand.u32 2147483647, %v957_v49  ;;  %v3277_v36 = vld [vmem:[#allocation91_spill] sm:$0xff]  ;;  %v3290_v51 = vld [vmem:[#allocation117_spill] sm:$0xff] }
 0x1c4   : > { %1227 = vmatpush.msra.mxu3 %v3276_v37  ;;  %v985_v21 = vor.u32 1.1754944e-38, %v984_v15  ;;  %v3278_v37 = vld [vmem:[#allocation93_spill] sm:$0xff]  ;;  %v3295_v15 = vld [vmem:[#allocation127_spill] sm:$0xff] }
 0x1c5   : > { %v962_v56 = vadd.f32 %v1646_v46, %v961_v53  ;;  %vm983_vm8 = vcmp.eq.f32.partialorder %v982_v59, 8.507059e+37  ;;  %v514_v53 = vld [vmem:[%s2790_s6 + $0x8] sm:$0xff]  ;;  %v3297_v59 = vld [vmem:[#allocation131_spill] sm:$0xff] }
 0x1c6   : > { %v845_v24 = vpop.f32.mrf.mxu2 }
 0x1c7   : > { %v966_v10 = vsel %vm965_vm3, %v1646_v46, %v962_v56  ;;  %v865_v26 = vpop.f32.mrf.mxu3  ;;  %v3286_v46 = vld [vmem:[#allocation109_spill] sm:$0xff] }
 0x1c8   : > { %v1650_v11 = vpop.eup %1649  ;;  %v971_v12 = vsel %vm968_vm4, %v970_v54, %v966_v10  ;;  %v866_v28 = vadd.f32 %v865_v26, %v845_v24 }
 0x1c9   : > { %v974_v13 = vmul.f32 %v1650_v11, %v957_v49  ;;  %vm979_vm6 = vweird.f32 %v1650_v11  ;;  %v1033_v18 = vmul.f32 %v1032_v14, %v971_v12  ;;  %v3293_v12 = vld [vmem:[#allocation123_spill] sm:$0xff] }
 0x1ca   : > { %vm980_vm7 = vmor %vm978_vm5, %vm979_vm6  ;;  %v988_v31 = vadd.f32 %v866_v28, %v513_v25  ;;  %v3304_v28 = vld [vmem:[#allocation141_spill] sm:$0xff] }
 0x1cb   : > { %v975_v17 = vsub.f32 1.0, %v974_v13  ;;  %v1034_v20 = vadd.f32 %v1033_v18, %v507_v16  ;;  %v3294_v13 = vld [vmem:[#allocation125_spill] sm:$0xff] }
 0x1cc   : > { %v1588_v34 = vmul.f32 -1.442695, %v988_v31  ;;  %v3296_v16 = vld [vmem:[#allocation129_spill] sm:$0xff] }
 0x1cd   : > { %v976_v19 = vmul.f32 %v1650_v11, %v975_v17  ;;  %1651 = vtanh.f32 %v1034_v20  ;;  %v3298_v18 = vld [vmem:[#allocation133_spill] sm:$0xff] }
 0x1ce   : > { %1653 = vpow2.f32 %v1588_v34 }
 0x1cf   : > { %v977_v22 = vadd.f32 %v1650_v11, %v976_v19 }
 0x1d1   : > { %v981_v23 = vsel %vm980_vm7, %v1650_v11, %v977_v22  ;;  %v3299_v22 = vld [vmem:[#allocation135_spill] sm:$0xff] }
 0x1d2   : > { %v986_v27 = vsel %vm983_vm8, %v985_v21, %v981_v23  ;;  %v3300_v23 = vld [vmem:[#allocation137_spill] sm:$0xff] }
 0x1d3   : > { %v1044_v29 = vsub.f32 1.0, %v986_v27  ;;  %v1046_v30 = vmul.f32 %v1780_v9, %v986_v27  ;;  %v1652_v32 = vpop.eup %1651  ;;  %v3303_v27 = vld [vmem:[#allocation139_spill] sm:$0xff] }
 0x1d4   : > { %v1654_v9 = vpop.eup %1653 }
 0x1d5   : > { %v1045_v33 = vmul.f32 %v1652_v32, %v1044_v29  ;;  %v996_v40 = vadd.f32 1.0, %v1654_v9 }
 0x1d7   : > { %v2794_v35 = vadd.f32 %v1046_v30, %v1045_v33  ;;  %1655 = vrcp.f32 %v996_v40  ;;  %vm1003_vm9 = vweird.f32 %v996_v40  ;;  %v1009_v21 = vand.u32 2147483648, %v996_v40  ;;  %v2834_v30 = vld [vmem:[%s2936_s8] ss:$0 sm:$0xff]  ;;  %v3305_v33 = vld [vmem:[#allocation143_spill] sm:$0xff] }
 0x1d8   : > { %v1007_v25 = vand.u32 2147483647, %v996_v40 }
 0x1d9   : > { %1088 = vmatmul.f32.vlgmr.msrb.gmra.mxu0 %v2794_v35  ;;  %1128 = vmatmul.f32.vlgmr.msrb.gmra.mxu2 %v2794_v35  ;;  %v1010_v32 = vor.u32 1.1754944e-38, %v1009_v21  ;;  %v3327_v21 = vld [vmem:[#allocation134_spill] sm:$0xff] }
 0x1da   : > { %1232 = vmatpush.msrb.mxu0 %v3277_v36  ;;  %1272 = vmatpush.msrb.mxu2 %v3278_v37  ;;  %vm1008_vm12 = vcmp.eq.f32.partialorder %v1007_v25, 8.507059e+37  ;;  %v3331_v25 = vld [vmem:[#allocation142_spill] sm:$0xff] }
 0x1dc   : > { %1233 = vmatpush.msrb.mxu0 %v3279_v38  ;;  %1273 = vmatpush.msrb.mxu2 %v3280_v39  ;;  %v515_v39 = vld [vmem:[%s2790_s6 + $0x10] sm:$0xff] }
 0x1dd   : > { %v1656_v49 = vpop.eup %1655 }
 0x1de   : > { %1234 = vmatpush.msrb.mxu0 %v3281_v41  ;;  %1274 = vmatpush.msrb.mxu2 %v3282_v42  ;;  %v999_v56 = vmul.f32 %v1656_v49, %v996_v40  ;;  %vm1004_vm10 = vweird.f32 %v1656_v49 }
 0x1df   : > { %vm2825_vm11 = vmor %vm1003_vm9, %vm1004_vm10 }
 0x1e0   : > { %1235 = vmatpush.msrb.mxu0 %v3283_v43  ;;  %1275 = vmatpush.msrb.mxu2 %v3284_v44  ;;  %v1000_v10 = vsub.f32 1.0, %v999_v56  ;;  %v3310_v56 = vld [vmem:[#allocation100_spill] sm:$0xff] }
 0x1e1   : > { %1168 = vmatmul.f32.vlgmr.msra.gmra.mxu0 %v2794_v35  ;;  %1208 = vmatmul.f32.vlgmr.msra.gmra.mxu2 %v2794_v35 }
 0x1e2   : > { %1236 = vmatpush.msrb.mxu0 %v3285_v45  ;;  %1276 = vmatpush.msrb.mxu2 %v3286_v46  ;;  %v1001_v17 = vmul.f32 %v1656_v49, %v1000_v10  ;;  %v3315_v10 = vld [vmem:[#allocation110_spill] sm:$0xff] }
 0x1e4   : > { %1237 = vmatpush.msrb.mxu0 %v3287_v47  ;;  %1277 = vmatpush.msrb.mxu2 %v3288_v48  ;;  %v1002_v24 = vadd.f32 %v1656_v49, %v1001_v17  ;;  %v3322_v17 = vld [vmem:[#allocation124_spill] sm:$0xff] }
 0x1e6   : > { %1238 = vmatpush.msrb.mxu0 %v3289_v50  ;;  %1278 = vmatpush.msrb.mxu2 %v3290_v51  ;;  %v1006_v36 = vsel %vm2825_vm11, %v1656_v49, %v1002_v24  ;;  %v3306_v51 = vld [vmem:[#allocation92_spill] sm:$0xff] }
 0x1e7   : > { %v1011_v38 = vsel %vm1008_vm12, %v1010_v32, %v1006_v36  ;;  %v3330_v24 = vld [vmem:[#allocation140_spill] sm:$0xff] }
 0x1e8   : > { %1239 = vmatpush.msrb.mxu0 %v3291_v2  ;;  %1279 = vmatpush.msrb.mxu2 %v3292_v3  ;;  %v3312_v2 = vld [vmem:[#allocation104_spill] sm:$0xff] }
 0x1e9   : > { %v3314_v3 = vld [vmem:[#allocation108_spill] sm:$0xff] }
 0x1ea   : > { %1240 = vmatpush.msrb.mxu0 %v3293_v12  ;;  %1280 = vmatpush.msrb.mxu2 %v3294_v13  ;;  %v3317_v12 = vld [vmem:[#allocation114_spill] sm:$0xff]  ;;  %v3318_v13 = vld [vmem:[#allocation116_spill] sm:$0xff] }
 0x1ec   : > { %1241 = vmatpush.msrb.mxu0 %v3295_v15  ;;  %1281 = vmatpush.msrb.mxu2 %v3296_v16  ;;  %v3320_v15 = vld [vmem:[#allocation120_spill] sm:$0xff]  ;;  %v3321_v16 = vld [vmem:[#allocation122_spill] sm:$0xff] }
 0x1ee   : > { %1242 = vmatpush.msrb.mxu0 %v3297_v59  ;;  %1282 = vmatpush.msrb.mxu2 %v3298_v18  ;;  %v3323_v59 = vld [vmem:[#allocation126_spill] sm:$0xff]  ;;  %v3324_v18 = vld [vmem:[#allocation128_spill] sm:$0xff] }
 0x1f0   : > { %1243 = vmatpush.msrb.mxu0 %v3299_v22  ;;  %1283 = vmatpush.msrb.mxu2 %v3300_v23  ;;  %v3328_v22 = vld [vmem:[#allocation136_spill] sm:$0xff]  ;;  %v3329_v23 = vld [vmem:[#allocation138_spill] sm:$0xff] }
 0x1f2   : > { %1244 = vmatpush.msrb.mxu0 %v3303_v27  ;;  %1284 = vmatpush.msrb.mxu2 %v3304_v28  ;;  %v1062_v27 = vld [vmem:[%s2893_s17 + $0x8] sm:$0xff] }
 0x1f4   : > { %1245 = vmatpush.msrb.mxu0 %v3305_v33  ;;  %1285 = vmatpush.msrb.mxu2 %v2607_v55 }
 0x1f6   : > { %1246 = vmatpush.msrb.mxu0 %v2613_v4  ;;  %1286 = vmatpush.msrb.mxu2 %v2619_v63 }
 0x1f8   : > { %1247 = vmatpush.msrb.mxu0 %v2625_v7  ;;  %1287 = vmatpush.msrb.mxu2 %v2631_v61 }
 0x1f9   : > { %1248 = vmatmul.f32.vlgmr.msrb.gmra.mxu0 %v2794_v35  ;;  %1288 = vmatmul.f32.vlgmr.msrb.gmra.mxu2 %v2794_v35 }
 0x1fe   : > { %v885_v52 = vpop.f32.mrf.mxu0 }
 0x1ff   : > { %v905_v54 = vpop.f32.mrf.mxu1 }
 0x200   : > { %v906_v1 = vadd.f32 %v905_v54, %v885_v52  ;;  %v3307_v52 = vld [vmem:[#allocation94_spill] sm:$0xff] }
 0x201   : > { %v3309_v54 = vld [vmem:[#allocation98_spill] sm:$0xff] }
 0x202   : > { %v989_v11 = vadd.f32 %v906_v1, %v514_v53  ;;  %v3308_v53 = vld [vmem:[#allocation96_spill] sm:$0xff]  ;;  %v3311_v1 = vld [vmem:[#allocation102_spill] sm:$0xff] }
 0x204   : > { %v1589_v14 = vmul.f32 -1.442695, %v989_v11  ;;  %v3316_v11 = vld [vmem:[#allocation112_spill] sm:$0xff] }
 0x206   : > { %1657 = vpow2.f32 %v1589_v14  ;;  %v925_v19 = vpop.f32.mrf.mxu2  ;;  %v3319_v14 = vld [vmem:[#allocation118_spill] sm:$0xff] }
 0x207   : > { %v945_v20 = vpop.f32.mrf.mxu3 }
 0x208   : > { %v946_v29 = vadd.f32 %v945_v20, %v925_v19  ;;  %v3325_v19 = vld [vmem:[#allocation130_spill] sm:$0xff]  ;;  %v3326_v20 = vld [vmem:[#allocation132_spill] sm:$0xff] }
 0x20a   : > { %v1040_v37 = vadd.f32 %v2834_v30, %v946_v29 }
 0x20c   : > { %v1658_v31 = vpop.eup %1657  ;;  %v1041_v55 = vmul.f32 %v1040_v37, %v1011_v38  ;;  %v1069_v37 = vld [vmem:[%s2897_s3] sm:$0xff] }
 0x20d   : > { %v997_v34 = vadd.f32 1.0, %v1658_v31 }
 0x20e   : > { %v1042_v41 = vadd.f32 %v1041_v55, %v515_v39 }
 0x20f   : > { %1659 = vrcp.f32 %v997_v34  ;;  %v1024_v42 = vand.u32 2147483648, %v997_v34  ;;  %v1022_v43 = vand.u32 2147483647, %v997_v34  ;;  %vm1018_vm14 = vweird.f32 %v997_v34 }
 0x210   : > { %1661 = vtanh.f32 %v1042_v41 }
 0x211   : > { %v1025_v7 = vor.u32 1.1754944e-38, %v1024_v42  ;;  %vm1023_vm0 = vcmp.eq.f32.partialorder %v1022_v43, 8.507059e+37 }
 0x215   : > { %v1660_v9 = vpop.eup %1659 }
 0x216   : > { %v1014_v40 = vmul.f32 %v1660_v9, %v997_v34  ;;  %vm1019_vm13 = vweird.f32 %v1660_v9  ;;  %v1662_v47 = vpop.eup %1661 }
 0x217   : > { %vm1020_vm15 = vmor %vm1018_vm14, %vm1019_vm13 }
 0x218   : > { %v1015_v4 = vsub.f32 1.0, %v1014_v40 }
 0x21a   : > { %v1016_v63 = vmul.f32 %v1660_v9, %v1015_v4 }
 0x21c   : > { %v1017_v44 = vadd.f32 %v1660_v9, %v1016_v63 }
 0x21e   : > { %v1021_v61 = vsel %vm1020_vm15, %v1660_v9, %v1017_v44 }
 0x21f   : > { %v1026_v45 = vsel %vm1023_vm0, %v1025_v7, %v1021_v61 }
 0x220   : > { %v1048_v46 = vsub.f32 1.0, %v1026_v45  ;;  %v1050_v49 = vmul.f32 %v1776_v8, %v1026_v45  ;;  %v3313_v8 = vld [vmem:[#allocation106_spill] sm:$0xff] }
 0x222   : > { %v1049_v48 = vmul.f32 %v1662_v47, %v1048_v46 }
 0x224   : > { %v2849_v50 = vadd.f32 %v1050_v49, %v1049_v48 }
 0x226   : > { %1108 = vmatmul.f32.vlgmr.msrb.gmra.mxu1 %v2849_v50  ;;  %1148 = vmatmul.f32.vlgmr.msrb.gmra.mxu3 %v2849_v50 }
 0x227   : > { %1252 = vmatpush.msrb.mxu1 %v3306_v51  ;;  %1292 = vmatpush.msrb.mxu3 %v3307_v52 }
 0x229   : > { %1253 = vmatpush.msrb.mxu1 %v3308_v53  ;;  %1293 = vmatpush.msrb.mxu3 %v3309_v54 }
 0x22b   : > { %1254 = vmatpush.msrb.mxu1 %v3310_v56  ;;  %1294 = vmatpush.msrb.mxu3 %v3311_v1 }
 0x22d   : > { %1255 = vmatpush.msrb.mxu1 %v3312_v2  ;;  %1295 = vmatpush.msrb.mxu3 %v3313_v8 }
 0x22e   : > { %1188 = vmatmul.f32.vlgmr.msra.gmra.mxu1 %v2849_v50  ;;  %1228 = vmatmul.f32.vlgmr.msra.gmra.mxu3 %v2849_v50 }
 0x22f   : > { %1256 = vmatpush.msrb.mxu1 %v3314_v3  ;;  %1296 = vmatpush.msrb.mxu3 %v3315_v10  ;;  %v1063_v3 = vld [vmem:[%s2893_s17 + $0x10] sm:$0xff] }
 0x231   : > { %1257 = vmatpush.msrb.mxu1 %v3316_v11  ;;  %1297 = vmatpush.msrb.mxu3 %v3317_v12  ;;  %v1070_v11 = vld [vmem:[%s2897_s3 + $0x8] sm:$0xff] }
 0x233   : > { %1258 = vmatpush.msrb.mxu1 %v3318_v13  ;;  %1298 = vmatpush.msrb.mxu3 %v3319_v14 }
 0x235   : > { %1259 = vmatpush.msrb.mxu1 %v3320_v15  ;;  %1299 = vmatpush.msrb.mxu3 %v3321_v16 }
 0x237   : > { %1260 = vmatpush.msrb.mxu1 %v3322_v17  ;;  %1300 = vmatpush.msrb.mxu3 %v3323_v59 }
 0x239   : > { %1261 = vmatpush.msrb.mxu1 %v3324_v18  ;;  %1301 = vmatpush.msrb.mxu3 %v3325_v19 }
 0x23b   : > { %1262 = vmatpush.msrb.mxu1 %v3326_v20  ;;  %1302 = vmatpush.msrb.mxu3 %v3327_v21 }
 0x23d   : > { %1263 = vmatpush.msrb.mxu1 %v3328_v22  ;;  %1303 = vmatpush.msrb.mxu3 %v3329_v23 }
 0x23f   : > { %1264 = vmatpush.msrb.mxu1 %v3330_v24  ;;  %1304 = vmatpush.msrb.mxu3 %v3331_v25 }
 0x241   : > { %1265 = vmatpush.msrb.mxu1 %v2603_v6  ;;  %1305 = vmatpush.msrb.mxu3 %v2609_v57  ;;  %v1061_v57 = vld [vmem:[%s2893_s17] sm:$0xff] }
 0x243   : > { %1266 = vmatpush.msrb.mxu1 %v2615_v5  ;;  %1306 = vmatpush.msrb.mxu3 %v2621_v58 }
 0x245   : > { %1267 = vmatpush.msrb.mxu1 %v2627_v62  ;;  %1307 = vmatpush.msrb.mxu3 %v2633_v60 }
 0x246   : > { %1268 = vmatmul.f32.vlgmr.msrb.gmra.mxu1 %v2849_v50  ;;  %1308 = vmatmul.f32.vlgmr.msrb.gmra.mxu3 %v2849_v50 }
 0x256   : > { %v1089_v6 = vpop.f32.mrf.mxu0 }
 0x25c   : > { %v1129_v5 = vpop.f32.mrf.mxu2 }
 0x25e   : > { %v1169_v63 = vpop.f32.mrf.mxu0 }
 0x264   : > { %v1209_v34 = vpop.f32.mrf.mxu2 }
 0x276   : > { %v1249_v2 = vpop.f32.mrf.mxu0 }
 0x2a3   : > { %v1109_v58 = vpop.f32.mrf.mxu1 }
 0x2a4   : > { %v1110_v62 = vadd.f32 %v1109_v58, %v1089_v6 }
 0x2a6   : > { %v1312_v60 = vadd.f32 %v1110_v62, %v1061_v57 }
 0x2a8   : > { %v1594_v26 = vmul.f32 -1.442695, %v1312_v60 }
 0x2a9   : > { %v1149_v28 = vpop.f32.mrf.mxu3 }
 0x2aa   : > { %1663 = vpow2.f32 %v1594_v26  ;;  %v1150_v29 = vadd.f32 %v1149_v28, %v1129_v5 }
 0x2ab   : > { %v1189_v43 = vpop.f32.mrf.mxu1 }
 0x2ac   : > { %v1313_v31 = vadd.f32 %v1150_v29, %v1062_v27  ;;  %v1190_v45 = vadd.f32 %v1189_v43, %v1169_v63  ;;  %v1289_v29 = vpop.f32.mrf.mxu2 }
 0x2ae   : > { %v1595_v32 = vmul.f32 -1.442695, %v1313_v31  ;;  %v1392_v1 = vadd.f32 %v2786_v0, %v1190_v45 }
 0x2b0   : > { %v1664_v33 = vpop.eup %1663  ;;  %1665 = vpow2.f32 %v1595_v32 }
 0x2b1   : > { %v1320_v36 = vadd.f32 1.0, %v1664_v33  ;;  %v1229_v38 = vpop.f32.mrf.mxu3 }
 0x2b2   : > { %v1230_v55 = vadd.f32 %v1229_v38, %v1209_v34 }
 0x2b3   : > { %1667 = vrcp.f32 %v1320_v36  ;;  %v1333_v7 = vand.u32 2147483648, %v1320_v36  ;;  %v1331_v47 = vand.u32 2147483647, %v1320_v36  ;;  %vm1327_vm2 = vweird.f32 %v1320_v36 }
 0x2b4   : > { %v1352_v39 = vadd.f32 %v1230_v55, %v1069_v37 }
 0x2b5   : > { %v1334_v53 = vor.u32 1.1754944e-38, %v1333_v7  ;;  %vm1332_vm4 = vcmp.eq.f32.partialorder %v1331_v47, 8.507059e+37 }
 0x2b6   : > { %v1666_v9 = vpop.eup %1665  ;;  %v1596_v40 = vmul.f32 -1.442695, %v1352_v39  ;;  %v1071_v39 = vld [vmem:[%s2897_s3 + $0x10] sm:$0xff] }
 0x2b7   : > { %v1321_v41 = vadd.f32 1.0, %v1666_v9 }
 0x2b8   : > { %1669 = vpow2.f32 %v1596_v40 }
 0x2b9   : > { %v1668_v4 = vpop.eup %1667  ;;  %1671 = vrcp.f32 %v1321_v41  ;;  %v1348_v8 = vand.u32 2147483648, %v1321_v41  ;;  %v1346_v16 = vand.u32 2147483647, %v1321_v41  ;;  %vm1342_vm6 = vweird.f32 %v1321_v41 }
 0x2ba   : > { %v1323_v42 = vmul.f32 %v1668_v4, %v1320_v36  ;;  %vm1328_vm1 = vweird.f32 %v1668_v4 }
 0x2bb   : > { %vm1329_vm3 = vmor %vm1327_vm2, %vm1328_vm1  ;;  %v1349_v20 = vor.u32 1.1754944e-38, %v1348_v8  ;;  %vm1347_vm8 = vcmp.eq.f32.partialorder %v1346_v16, 8.507059e+37  ;;  %v1436_v16 = vld [vmem:[#allocation8 + $0xb8] sm:$0xff] (%p490_p0) }
 0x2bc   : > { %v1324_v44 = vsub.f32 1.0, %v1323_v42 }
 0x2be   : > { %v1670_v61 = vpop.eup %1669  ;;  %v1325_v46 = vmul.f32 %v1668_v4, %v1324_v44 }
 0x2bf   : > { %v1672_v48 = vpop.eup %1671  ;;  %v1360_v49 = vadd.f32 1.0, %v1670_v61 }
 0x2c0   : > { %v1338_v51 = vmul.f32 %v1672_v48, %v1321_v41  ;;  %v1326_v52 = vadd.f32 %v1668_v4, %v1325_v46  ;;  %vm1343_vm5 = vweird.f32 %v1672_v48 }
 0x2c1   : > { %1673 = vrcp.f32 %v1360_v49  ;;  %vm1344_vm7 = vmor %vm1342_vm6, %vm1343_vm5  ;;  %vm1367_vm10 = vweird.f32 %v1360_v49  ;;  %v1373_v62 = vand.u32 2147483648, %v1360_v49  ;;  %v1371_v27 = vand.u32 2147483647, %v1360_v49 }
 0x2c2   : > { %v1339_v54 = vsub.f32 1.0, %v1338_v51  ;;  %v1330_v56 = vsel %vm1329_vm3, %v1668_v4, %v1326_v52  ;;  %v1427_v51 = vld [vmem:[#allocation8 + $0x70] sm:$0xff] (%p490_p0)  ;;  %v1444_v52 = vld [vmem:[#allocation8 + $0xf8] sm:$0xff] (%p490_p0) }
 0x2c3   : > { %v1335_v10 = vsel %vm1332_vm4, %v1334_v53, %v1330_v56  ;;  %v1269_v12 = vpop.f32.mrf.mxu1  ;;  %v1374_v36 = vor.u32 1.1754944e-38, %v1373_v62  ;;  %vm1372_vm12 = vcmp.eq.f32.partialorder %v1371_v27, 8.507059e+37  ;;  %1469 = vmatpush.msra.mxu1 (%p490_p0), %v1444_v52  ;;  %v1426_v53 = vld [vmem:[#allocation8 + $0x68] sm:$0xff] (%p490_p0)  ;;  %v1425_v56 = vld [vmem:[#allocation8 + $0x60] sm:$0xff] (%p490_p0) }
 0x2c4   : > { %v1340_v13 = vmul.f32 %v1672_v48, %v1339_v54  ;;  %v1393_v14 = vmul.f32 %v1392_v1, %v1335_v10  ;;  %v1270_v15 = vadd.f32 %v1269_v12, %v1249_v2  ;;  %v1442_v54 = vld [vmem:[#allocation8 + $0xe8] sm:$0xff] (%p490_p0)  ;;  %v1441_v1 = vld [vmem:[#allocation8 + $0xe0] sm:$0xff] (%p490_p0)  ;;  %v1424_v2 = vld [vmem:[#allocation8 + $0x58] sm:$0xff] (%p490_p0) }
 0x2c5   :  { %v1423_v10 = vld [vmem:[#allocation8 + $0x50] sm:$0xff] (%p490_p0)  ;;  %v1438_v12 = vld [vmem:[#allocation8 + $0xc8] sm:$0xff] (%p490_p0)  ;;  %v1683_v62 = vld [vmem:[%s2938_s10] ss:$0 sm:$0xff] (%p490_p0) }
 0x2c6   : > { %v1341_v17 = vadd.f32 %v1672_v48, %v1340_v13  ;;  %v1394_v59 = vadd.f32 %v1393_v14, %v1063_v3  ;;  %v1353_v18 = vadd.f32 %v1270_v15, %v1070_v11  ;;  %v1440_v3 = vld [vmem:[#allocation8 + $0xd8] sm:$0xff] (%p490_p0)  ;;  %v1439_v11 = vld [vmem:[#allocation8 + $0xd0] sm:$0xff] (%p490_p0)  ;;  %v1421_v13 = vld [vmem:[#allocation8 + $0x40] sm:$0xff] (%p490_p0) }
 0x2c7   : > { %v1674_v19 = vpop.eup %1673  ;;  %v1437_v14 = vld [vmem:[#allocation8 + $0xc0] sm:$0xff] (%p490_p0)  ;;  %v1420_v15 = vld [vmem:[#allocation8 + $0x38] sm:$0xff] (%p490_p0) }
 0x2c8   : > { %v1345_v21 = vsel %vm1344_vm7, %v1672_v48, %v1341_v17  ;;  %1675 = vtanh.f32 %v1394_v59  ;;  %v1597_v0 = vmul.f32 -1.442695, %v1353_v18  ;;  %v1363_v22 = vmul.f32 %v1674_v19, %v1360_v49  ;;  %v1428_v49 = vld [vmem:[#allocation8 + $0x78] sm:$0xff] (%p490_p0)  ;;  %v1419_v17 = vld [vmem:[#allocation8 + $0x30] sm:$0xff] (%p490_p0)  ;;  %v1418_v18 = vld [vmem:[#allocation8 + $0x28] sm:$0xff] (%p490_p0) }
 0x2c9   : > { %v1350_v23 = vsel %vm1347_vm8, %v1349_v20, %v1345_v21  ;;  %vm1368_vm9 = vweird.f32 %v1674_v19  ;;  %v1309_v58 = vpop.f32.mrf.mxu3  ;;  %1449 = vmatpush.msra.mxu0 (%p490_p0), %v1428_v49  ;;  %v1435_v59 = vld [vmem:[#allocation8 + $0xb0] sm:$0xff] (%p490_p0)  ;;  %v1417_v20 = vld [vmem:[#allocation8 + $0x20] sm:$0xff] (%p490_p0) }
 0x2ca   : > { %1677 = vpow2.f32 %v1597_v0  ;;  %v1364_v24 = vsub.f32 1.0, %v1363_v22  ;;  %v1400_v25 = vsub.f32 1.0, %v1350_v23  ;;  %v1402_v5 = vmul.f32 %v1350_v23, %v2794_v35  ;;  %vm1369_vm11 = vmor %vm1367_vm10, %vm1368_vm9  ;;  %v1433_v21 = vld [vmem:[#allocation8 + $0xa0] sm:$0xff] (%p490_p0)  ;;  %v1416_v0 = vld [vmem:[#allocation8 + $0x18] sm:$0xff] (%p490_p0) }
 0x2cb   : > { %v1310_v33 = vadd.f32 %v1309_v58, %v1289_v29  ;;  %1450 = vmatpush.msra.mxu0 (%p490_p0), %v1427_v51  ;;  %v1432_v22 = vld [vmem:[#allocation8 + $0x98] sm:$0xff] (%p490_p0)  ;;  %v1415_v23 = vld [vmem:[#allocation8 + $0x10] sm:$0xff] (%p490_p0)  ;;  %v1429_v58 = vld [vmem:[#allocation8 + $0x80] sm:$0xff] (%p490_p0) }
 0x2cc   : > { %v1365_v6 = vmul.f32 %v1674_v19, %v1364_v24  ;;  %v1431_v24 = vld [vmem:[#allocation8 + $0x90] sm:$0xff] (%p490_p0) }
 0x2cd   : > { %v1396_v38 = vadd.f32 %v2834_v30, %v1310_v33  ;;  %1451 = vmatpush.msra.mxu0 (%p490_p0), %v1426_v53 }
 0x2ce   : > { %v1676_v57 = vpop.eup %1675  ;;  %v1366_v26 = vadd.f32 %v1674_v19, %v1365_v6  ;;  %v1430_v6 = vld [vmem:[#allocation8 + $0x88] sm:$0xff] (%p490_p0) }
 0x2cf   : > { %v1401_v60 = vmul.f32 %v1676_v57, %v1400_v25  ;;  %1452 = vmatpush.msra.mxu0 (%p490_p0), %v1425_v56  ;;  %v1414_v25 = vld [vmem:[#allocation8 + $0x8] sm:$0xff] (%p490_p0)  ;;  %v1413_v57 = vld [vmem:[#allocation8] sm:$0xff] (%p490_p0) }
 0x2d0   : > { %v1678_v28 = vpop.eup %1677  ;;  %v1370_v34 = vsel %vm1369_vm11, %v1674_v19, %v1366_v26  ;;  %v1434_v19 = vld [vmem:[#allocation8 + $0xa8] sm:$0xff] (%p490_p0) }
 0x2d1   : > { %v2904_v9 = vadd.f32 %v1402_v5, %v1401_v60   ;;  %v1361_v32 = vadd.f32 1.0, %v1678_v28  ;;  %v1375_v37 = vsel %vm1372_vm12, %v1374_v36, %v1370_v34  ;;  %1453 = vmatpush.msra.mxu0 (%p490_p0), %v1424_v2 }
 0x2d2   : > { %v1397_v55 = vmul.f32 %v1396_v38, %v1375_v37 }
 0x2d3   : > { %v3332_v31 = vmov %v2904_v9  ;;  %1679 = vrcp.f32 %v1361_v32  ;;  %v1388_v42 = vand.u32 2147483648, %v1361_v32  ;;  %v1386_v43 = vand.u32 2147483647, %v1361_v32  ;;  %1454 = vmatpush.msra.mxu0 (%p490_p0), %v1423_v10 }
 0x2d4   : > { %v1398_v41 = vadd.f32 %v1397_v55, %v1071_v39  ;;  %vm1382_vm14 = vweird.f32 %v1361_v32 }
 0x2d5   : > { %v1389_v44 = vor.u32 1.1754944e-38, %v1388_v42  ;;  %vm1387_vm0 = vcmp.eq.f32.partialorder %v1386_v43, 8.507059e+37 }
 0x2d6   : > { %1681 = vtanh.f32 %v1398_v41 }
 0x2d9   : > { %v1680_v35 = vpop.eup %1679 }
 0x2da   : > { %v1378_v40 = vmul.f32 %v1680_v35, %v1361_v32  ;;  %vm1383_vm13 = vweird.f32 %v1680_v35 }
 0x2db   : > { %vm1384_vm15 = vmor %vm1382_vm14, %vm1383_vm13 }
 0x2dc   : > { %v1379_v4 = vsub.f32 1.0, %v1378_v40  ;;  %v1682_v30 = vpop.eup %1681 }
 0x2de   : > { %v1380_v63 = vmul.f32 %v1680_v35, %v1379_v4 }
 0x2e0   : > { %v1381_v9 = vadd.f32 %v1680_v35, %v1380_v63 }
 0x2e2   : > { %v1385_v7 = vsel %vm1384_vm15, %v1680_v35, %v1381_v9  ;;  %v3335_v9 = vmov %v3332_v31 }
 0x2e3   : > { %v1390_v61 = vsel %vm1387_vm0, %v1389_v44, %v1385_v7 }
 0x2e4   : > { %v1404_v45 = vsub.f32 1.0, %v1390_v61  ;;  %v1406_v47 = vmul.f32 %v1390_v61, %v2849_v50  ;;  %v1443_v50 = vld [vmem:[#allocation8 + $0xf0] sm:$0xff] (%p490_p0) }
 0x2e5   :  { %1470 = vmatpush.msra.mxu1 (%p490_p0), %v1443_v50 }
 0x2e6   : > { %v1405_v46 = vmul.f32 %v1682_v30, %v1404_v45 }
 0x2e7   :  { %492 = sbr.rel (!%p490_p0) target bundleno = 240 (0xf0), region = 94  ;;  %1471 = vmatpush.msra.mxu1 (%p490_p0), %v1442_v54 }
 0x2e8   : > { %v2909_v8 = vadd.f32 %v1406_v47, %v1405_v46  }
 0x2e9   :  { %1472 = vmatpush.msra.mxu1 (%p490_p0), %v1441_v1 }
 0x2ea   : > { %v3333_v48 = vmov %v2909_v8 }
 0x2eb   : > { %v3334_v8 = vmov %v3333_v48  ;;  %1473 = vmatpush.msra.mxu1 (%p490_p0), %v1440_v3 }
 0x2ec   :  { %v1422_v8 = vld [vmem:[#allocation8 + $0x48] sm:$0xff] }
 0x2ed   :  { %1474 = vmatpush.msra.mxu1 %v1439_v11  ;;  %1455 = vmatpush.msra.mxu0 %v1422_v8 }
 0x2ef   :  { %1475 = vmatpush.msra.mxu1 %v1438_v12  ;;  %1456 = vmatpush.msra.mxu0 %v1421_v13 }
 0x2f1   :  { %1476 = vmatpush.msra.mxu1 %v1437_v14  ;;  %1457 = vmatpush.msra.mxu0 %v1420_v15 }
 0x2f3   :  { %1477 = vmatpush.msra.mxu1 %v1436_v16  ;;  %1458 = vmatpush.msra.mxu0 %v1419_v17 }
 0x2f5   :  { %1478 = vmatpush.msra.mxu1 %v1435_v59  ;;  %1459 = vmatpush.msra.mxu0 %v1418_v18 }
 0x2f7   :  { %1479 = vmatpush.msra.mxu1 %v1434_v19  ;;  %1460 = vmatpush.msra.mxu0 %v1417_v20 }
 0x2f9   :  { %1480 = vmatpush.msra.mxu1 %v1433_v21  ;;  %1461 = vmatpush.msra.mxu0 %v1416_v0 }
 0x2fb   :  { %1481 = vmatpush.msra.mxu1 %v1432_v22  ;;  %1462 = vmatpush.msra.mxu0 %v1415_v23 }
 0x2fd   :  { %1482 = vmatpush.msra.mxu1 %v1431_v24  ;;  %1463 = vmatpush.msra.mxu0 %v1414_v25 }
 0x2ff   :  { %1483 = vmatpush.msra.mxu1 %v1430_v6  ;;  %1464 = vmatpush.msra.mxu0 %v1413_v57 }
 0x300   :  { %1465 = vmatmul.f32.vlgmr.msra.gmra.mxu0 %v3332_v31 }
 0x301   :  { %1484 = vmatpush.msra.mxu1 %v1429_v58 }
 0x302   :  { %1485 = vmatmul.f32.vlgmr.msra.gmra.mxu1 %v3333_v48 }
 0x37d   :  { %v1466_v60 = vpop.f32.mrf.mxu0 }
 0x37e   :  { %v1467_v26 = vadd.f32 %v1683_v62, %v1466_v60 }
 0x37f   :  { %v1486_v5 = vpop.f32.mrf.mxu1 }
 0x380   :  { %v1487_v27 = vadd.f32 %v1486_v5, %v1467_v26 }
 0x382   :  { %1489 = vst [vmem:[#allocation10] sm:$0xff] %v1487_v27 }
 0x383   :  { %1500 = dma.vmem_to_hbm [thread:$0]  %s1496_s1, 128, %s1498_s21, [#allocation7]  }
 0x384   :  { %1772 = dma.done.wait [#allocation7], 128  }
 0x385   :  { %1773 = vsyncadd [#allocation7], 4294967168 }
 0x386   :  { %1505 = vsyncpa [#allocation6], 1 }
 0x387   :  { %1506 = vsyncpa [#allocation9], 1 }
 0x388   :  { %1507 = vsyncpa [#allocation7], 1 }

</bundles_post_ra>
